<compile_context>
chip_gen: v5e
topology: v5e:2x2
jax: 0.10.0
libtpu: 0.0.40
codegen_flags: <defaults>
</compile_context>

<pallas_src>
import jax
import jax.numpy as jnp
import numpy as np
from jax import lax
from jax.experimental import pallas as pl
from jax.experimental.pallas import tpu as pltpu


def _make_triplet_kernel(margin, tile, B):
    dims = (((1,), (1,)), ((), ()))  # contract over feature dim D of both operands

    def kernel(lab_row_ref, lab_col_ref, sq_row_ref, sq_col_ref, emb_ref,
               sum_ref, cnt_ref, d_scratch):
        t = pl.program_id(0)
        start = pl.multiple_of(t * tile, tile)

        emb = emb_ref[...]                       # (B, D) f32, resident in VMEM
        sq_row = sq_row_ref[...]                 # (1, B)  |x_k|^2 (lane layout)
        sq_col = sq_col_ref[...]                 # (B, 1)  |x_j|^2 (sublane layout)
        lab_row = lab_row_ref[...]               # (1, B) int32
        lab_col = lab_col_ref[...]               # (B, 1) int32

        # ---- hoisted per-tile work: one full-width MXU matmul for the tile ----
        emb_tile = emb_ref[pl.ds(start, tile), :]                    # (tile, D)
        g_row = lax.dot_general(emb_tile, emb, dims,
                                preferred_element_type=jnp.float32)  # (tile, B)
        sq_tile = sq_col_ref[pl.ds(start, tile), :]                  # (tile, 1)
        # squared pairwise distances d[i, k] for all anchors i in this tile
        d_scratch[...] = jnp.maximum(sq_tile - 2.0 * g_row + sq_row, 0.0)

        col_iota = lax.broadcasted_iota(jnp.int32, (B, 1), 0)        # row index j

        def body(a, carry):
            s_acc, c_acc = carry
            i = start + a                                            # global anchor

            # d[i, k] in row layout (1, B) — sliced from the precomputed tile block
            an = d_scratch[pl.ds(a, 1), :]

            # d[i, j] in column layout (B, 1) — one small (B x D x 1) matmul; the
            # MXU slot is otherwise idle during the VALU-heavy triplet pass.
            anchor = emb_ref[pl.ds(i, 1), :]                          # (1, D)
            dot_col = lax.dot_general(emb, anchor, dims,
                                      preferred_element_type=jnp.float32)  # (B, 1)
            sq_i = sq_col_ref[pl.ds(i, 1), :]                         # (1, 1)
            ap = jnp.maximum(sq_i - 2.0 * dot_col + sq_col, 0.0)      # (B, 1)

            # validity mask (simplified): (lab_j==lab_i & j!=i) x (lab_k!=lab_i)
            lab_i = lab_col_ref[pl.ds(i, 1), :]                       # (1, 1)
            pos = (lab_col == lab_i) & (col_iota != i)                # (B, 1)
            neg = lab_row != lab_i                                    # (1, B)

            # fused hinge + mask + count: raw[j,k] = d[i,j] + margin - d[i,k]
            raw = (ap + margin) - an                                  # (B, B)
            hit = (pos & neg) & (raw > 0.0)                           # positive triplets
            tl = jnp.where(hit, raw, 0.0)

            s_acc = s_acc + jnp.sum(tl, keepdims=True)
            c_acc = c_acc + jnp.sum(hit.astype(jnp.float32), keepdims=True)
            return s_acc, c_acc

        init = (jnp.zeros((1, 1), jnp.float32), jnp.zeros((1, 1), jnp.float32))
        s, c = lax.fori_loop(0, tile, body, init, unroll=(tile <= 16))

        # per-tile partial outputs, broadcast into a lane-dense (1, 8, 128) block
        # (keeps block shape (8,128)-aligned; wrapper reads element [t, 0, 0]).
        sum_ref[...] = jnp.broadcast_to(s.reshape(1, 1, 1), sum_ref.shape)
        cnt_ref[...] = jnp.broadcast_to(c.reshape(1, 1, 1), cnt_ref.shape)

    return kernel


def triplet_loss(embeddings, labels, margin=0.5):
    """Pallas equivalent of TripletLoss().forward(pred=embeddings, target=labels)."""
    B, D = embeddings.shape
    e = embeddings.astype(jnp.float32)
    lab = labels.astype(jnp.int32)
    lab_row = lab.reshape(1, B)
    lab_col = lab.reshape(B, 1)

    # hoisted grid-invariant row norms (both layouts, so the kernel never transposes)
    sq = jnp.sum(e * e, axis=1)
    sq_row = sq.reshape(1, B)
    sq_col = sq.reshape(B, 1)

    # anchor tile per grid step: largest divisor of B that is <= 256
    tile = B
    for cand in (256, 128, 64, 32, 16, 8):
        if B >= cand and B % cand == 0:
            tile = cand
            break
    num_tiles = B // tile

    psum, pcnt = pl.pallas_call(
        _make_triplet_kernel(float(margin), tile, B),
        out_shape=(jax.ShapeDtypeStruct((num_tiles, 8, 128), jnp.float32),
                   jax.ShapeDtypeStruct((num_tiles, 8, 128), jnp.float32)),
        grid_spec=pltpu.PrefetchScalarGridSpec(
            num_scalar_prefetch=0,
            grid=(num_tiles,),                  # one grid step per anchor tile
            in_specs=[
                pl.BlockSpec((1, B), lambda t: (0, 0)),   # labels, lane row
                pl.BlockSpec((B, 1), lambda t: (0, 0)),   # labels, sublane col
                pl.BlockSpec((1, B), lambda t: (0, 0)),   # |x|^2, lane row
                pl.BlockSpec((B, 1), lambda t: (0, 0)),   # |x|^2, sublane col
                pl.BlockSpec((B, D), lambda t: (0, 0)),   # embeddings (resident)
            ],
            out_specs=[
                pl.BlockSpec((1, 8, 128), lambda t: (t, 0, 0)),  # partial sum
                pl.BlockSpec((1, 8, 128), lambda t: (t, 0, 0)),  # partial count
            ],
            scratch_shapes=[
                pltpu.VMEM((tile, B), jnp.float32),       # anchor-tile distance block
            ],
        ),
        compiler_params=pltpu.CompilerParams(dimension_semantics=("parallel",)),
    )(lab_row, lab_col, sq_row, sq_col, e)

    total = jnp.sum(psum[:, 0, 0])
    npos = jnp.sum(pcnt[:, 0, 0])
    return total / (npos + 1e-16)


def triplet_loss_ref(embeddings, labels, margin=0.5):
    """Pure-JAX reference mirroring the PyTorch code (squared=True)."""
    e = embeddings.astype(jnp.float32)
    dot = e @ e.T
    sq = jnp.diag(dot)
    d = jnp.maximum(sq[:, None] - 2.0 * dot + sq[None, :], 0.0)
    tl = d[:, :, None] - d[:, None, :] + margin
    B = labels.shape[0]
    idx = jnp.arange(B)
    ne = idx[:, None] != idx[None, :]
    distinct = ne[:, :, None] & ne[:, None, :] & ne[None, :, :]
    leq = labels[:, None] == labels[None, :]
    valid = leq[:, :, None] & (~leq)[:, None, :] & distinct
    tl = jnp.maximum(tl * valid.astype(jnp.float32), 0.0)
    npos = jnp.sum((tl > 0).astype(jnp.float32))
    return jnp.sum(tl) / (npos + 1e-16)


if __name__ == "__main__":
    key = jax.random.PRNGKey(0)
    k1, k2 = jax.random.split(key)
    B, D = 8, 32
    embeddings = jax.random.normal(k1, (B, D), dtype=jnp.float32)
    labels = jax.random.randint(k2, (B,), 0, 3, dtype=jnp.int32)

    loss = triplet_loss(embeddings, labels, margin=0.5)
    loss = jax.block_until_ready(loss)

    ref = triplet_loss_ref(embeddings, labels, margin=0.5)
    np.testing.assert_allclose(np.asarray(loss), np.asarray(ref), rtol=1e-4, atol=1e-5)
    print("KERNEL_OK")
</pallas_src>

<mosaic_0001>
module attributes {stable_mosaic.version = 11 : i64} {
  func.func @kernel(%arg0: i32, %arg1: memref<1x8xi32, #tpu.memory_space<vmem>>, %arg2: memref<8x1xi32, #tpu.memory_space<vmem>>, %arg3: memref<1x8xf32, #tpu.memory_space<vmem>>, %arg4: memref<8x1xf32, #tpu.memory_space<vmem>>, %arg5: memref<8x32xf32, #tpu.memory_space<vmem>>, %arg6: memref<1x8x128xf32, #tpu.memory_space<vmem>>, %arg7: memref<1x8x128xf32, #tpu.memory_space<vmem>>, %arg8: memref<8x8xf32, #tpu.memory_space<vmem>>) attributes {dimension_semantics = [#tpu.dimension_semantics<parallel>], iteration_bounds = array<i64: 1>, scalar_prefetch = 0 : i64, scratch_operands = 1 : i64, tpu.core_type = #tpu.core_type<tc>, window_params = [{pipeline_mode = #tpu.pipeline_mode<synchronous>, transform_indices = @transform_0, window_bounds = array<i64: 1, 8>}, {pipeline_mode = #tpu.pipeline_mode<synchronous>, transform_indices = @transform_1, window_bounds = array<i64: 8, 1>}, {pipeline_mode = #tpu.pipeline_mode<synchronous>, transform_indices = @transform_2, window_bounds = array<i64: 1, 8>}, {pipeline_mode = #tpu.pipeline_mode<synchronous>, transform_indices = @transform_3, window_bounds = array<i64: 8, 1>}, {pipeline_mode = #tpu.pipeline_mode<synchronous>, transform_indices = @transform_4, window_bounds = array<i64: 8, 32>}, {transform_indices = @transform_5, window_bounds = array<i64: 1, 8, 128>}, {transform_indices = @transform_6, window_bounds = array<i64: 1, 8, 128>}]} {
    %c8_i32 = arith.constant 8 : i32
    %0 = arith.muli %arg0, %c8_i32 : i32
    %1 = tpu.assume_multiple %0, 8 : i32
    %c0 = arith.constant 0 : index
    %c0_0 = arith.constant 0 : index
    %2 = vector.load %arg5[%c0, %c0_0] : memref<8x32xf32, #tpu.memory_space<vmem>>, vector<8x32xf32>
    %c0_1 = arith.constant 0 : index
    %c0_2 = arith.constant 0 : index
    %3 = vector.load %arg3[%c0_1, %c0_2] : memref<1x8xf32, #tpu.memory_space<vmem>>, vector<1x8xf32>
    %c0_3 = arith.constant 0 : index
    %c0_4 = arith.constant 0 : index
    %4 = vector.load %arg4[%c0_3, %c0_4] : memref<8x1xf32, #tpu.memory_space<vmem>>, vector<8x1xf32>
    %c0_5 = arith.constant 0 : index
    %c0_6 = arith.constant 0 : index
    %5 = vector.load %arg1[%c0_5, %c0_6] : memref<1x8xi32, #tpu.memory_space<vmem>>, vector<1x8xi32>
    %c0_7 = arith.constant 0 : index
    %c0_8 = arith.constant 0 : index
    %6 = vector.load %arg2[%c0_7, %c0_8] : memref<8x1xi32, #tpu.memory_space<vmem>>, vector<8x1xi32>
    %7 = arith.index_cast %1 : i32 to index
    %c0_9 = arith.constant 0 : index
    %8 = vector.load %arg5[%7, %c0_9] : memref<8x32xf32, #tpu.memory_space<vmem>>, vector<8x32xf32>
    %cst = arith.constant dense<0.000000e+00> : vector<8x8xf32>
    %9 = tpu.matmul %8, %2, %cst {dimension_numbers = #tpu.dot_dimension_numbers<[1], [1], [0], [0], [0, 0, 1, 0], [], []>} : vector<8x32xf32>, vector<8x32xf32>, vector<8x8xf32> -> vector<8x8xf32>
    %10 = arith.index_cast %1 : i32 to index
    %c0_10 = arith.constant 0 : index
    %11 = vector.load %arg4[%10, %c0_10] : memref<8x1xf32, #tpu.memory_space<vmem>>, vector<8x1xf32>
    %cst_11 = arith.constant 2.000000e+00 : f32
    %12 = vector.broadcast %cst_11 : f32 to vector<8x8xf32>
    %13 = arith.mulf %12, %9 : vector<8x8xf32>
    %14 = vector.broadcast %11 : vector<8x1xf32> to vector<8x8xf32>
    %15 = arith.subf %14, %13 : vector<8x8xf32>
    %16 = vector.broadcast %3 : vector<1x8xf32> to vector<8x8xf32>
    %17 = arith.addf %15, %16 : vector<8x8xf32>
    %cst_12 = arith.constant 0.000000e+00 : f32
    %18 = vector.broadcast %cst_12 : f32 to vector<8x8xf32>
    %19 = arith.maximumf %17, %18 : vector<8x8xf32>
    %c0_13 = arith.constant 0 : index
    %c0_14 = arith.constant 0 : index
    %20 = vector.load %arg8[%c0_13, %c0_14] : memref<8x8xf32, #tpu.memory_space<vmem>>, vector<8x8xf32>
    tpu.vector_store %arg8[%c0_13, %c0_14], %19 {strides = array<i32>} : memref<8x8xf32, #tpu.memory_space<vmem>>, vector<8x8xf32>,
    %21 = tpu.iota {dimensions = array<i32: 0>} : vector<8x1xi32>
    %cst_15 = arith.constant 0.000000e+00 : f32
    %22 = vector.broadcast %cst_15 : f32 to vector<1x1xf32>
    %cst_16 = arith.constant 0.000000e+00 : f32
    %23 = vector.broadcast %cst_16 : f32 to vector<1x1xf32>
    %c0_i32 = arith.constant 0 : i32
    %24 = arith.addi %1, %c0_i32 : i32
    %25 = arith.index_cast %c0_i32 : i32 to index
    %c0_17 = arith.constant 0 : index
    %26 = vector.load %arg8[%25, %c0_17] : memref<8x8xf32, #tpu.memory_space<vmem>>, vector<1x8xf32>
    %27 = arith.index_cast %24 : i32 to index
    %c0_18 = arith.constant 0 : index
    %28 = vector.load %arg5[%27, %c0_18] : memref<8x32xf32, #tpu.memory_space<vmem>>, vector<1x32xf32>
    %cst_19 = arith.constant dense<0.000000e+00> : vector<8x1xf32>
    %29 = tpu.matmul %2, %28, %cst_19 {dimension_numbers = #tpu.dot_dimension_numbers<[1], [1], [0], [0], [0, 0, 1, 0], [], []>} : vector<8x32xf32>, vector<1x32xf32>, vector<8x1xf32> -> vector<8x1xf32>
    %30 = arith.index_cast %24 : i32 to index
    %c0_20 = arith.constant 0 : index
    %31 = vector.load %arg4[%30, %c0_20] : memref<8x1xf32, #tpu.memory_space<vmem>>, vector<1x1xf32>
    %cst_21 = arith.constant 2.000000e+00 : f32
    %32 = vector.broadcast %cst_21 : f32 to vector<8x1xf32>
    %33 = arith.mulf %32, %29 : vector<8x1xf32>
    %34 = vector.broadcast %31 : vector<1x1xf32> to vector<8x1xf32>
    %35 = arith.subf %34, %33 : vector<8x1xf32>
    %36 = arith.addf %35, %4 : vector<8x1xf32>
    %cst_22 = arith.constant 0.000000e+00 : f32
    %37 = vector.broadcast %cst_22 : f32 to vector<8x1xf32>
    %38 = arith.maximumf %36, %37 : vector<8x1xf32>
    %39 = arith.index_cast %24 : i32 to index
    %c0_23 = arith.constant 0 : index
    %40 = vector.load %arg2[%39, %c0_23] : memref<8x1xi32, #tpu.memory_space<vmem>>, vector<1x1xi32>
    %41 = vector.broadcast %40 : vector<1x1xi32> to vector<8x1xi32>
    %42 = arith.cmpi eq, %6, %41 : vector<8x1xi32>
    %43 = vector.broadcast %24 : i32 to vector<8x1xi32>
    %44 = arith.cmpi ne, %21, %43 : vector<8x1xi32>
    %45 = arith.andi %42, %44 : vector<8x1xi1>
    %46 = vector.broadcast %40 : vector<1x1xi32> to vector<1x8xi32>
    %47 = arith.cmpi ne, %5, %46 : vector<1x8xi32>
    %cst_24 = arith.constant 5.000000e-01 : f32
    %48 = vector.broadcast %cst_24 : f32 to vector<8x1xf32>
    %49 = arith.addf %38, %48 : vector<8x1xf32>
    %50 = vector.broadcast %49 : vector<8x1xf32> to vector<8x8xf32>
    %51 = vector.broadcast %26 : vector<1x8xf32> to vector<8x8xf32>
    %52 = arith.subf %50, %51 : vector<8x8xf32>
    %53 = vector.broadcast %45 : vector<8x1xi1> to vector<8x8xi1>
    %54 = vector.broadcast %47 : vector<1x8xi1> to vector<8x8xi1>
    %55 = arith.andi %53, %54 : vector<8x8xi1>
    %cst_25 = arith.constant 0.000000e+00 : f32
    %56 = vector.broadcast %cst_25 : f32 to vector<8x8xf32>
    %57 = arith.cmpf ogt, %52, %56 : vector<8x8xf32>
    %58 = arith.andi %55, %57 : vector<8x8xi1>
    %cst_26 = arith.constant 0.000000e+00 : f32
    %59 = vector.broadcast %cst_26 : f32 to vector<8x8xf32>
    %60 = arith.select %58, %52, %59 : vector<8x8xi1>, vector<8x8xf32>
    %61 = vector.shape_cast %60 : vector<8x8xf32> to vector<1x8x8xf32>
    %cst_27 = arith.constant dense<0.000000e+00> : vector<1xf32>
    %62 = vector.multi_reduction <add>, %61, %cst_27 [1, 2] : vector<1x8x8xf32> to vector<1xf32>
    %63 = vector.shape_cast %62 : vector<1xf32> to vector<1x1x1xf32>
    %64 = vector.extract %63[0, 0, 0] : f32 from vector<1x1x1xf32>
    %65 = vector.broadcast %64 : f32 to vector<1x1xf32>
    %66 = arith.addf %22, %65 : vector<1x1xf32>
    %67 = arith.extui %58 : vector<8x8xi1> to vector<8x8xi32>
    %68 = arith.sitofp %67 : vector<8x8xi32> to vector<8x8xf32>
    %69 = vector.shape_cast %68 : vector<8x8xf32> to vector<1x8x8xf32>
    %cst_28 = arith.constant dense<0.000000e+00> : vector<1xf32>
    %70 = vector.multi_reduction <add>, %69, %cst_28 [1, 2] : vector<1x8x8xf32> to vector<1xf32>
    %71 = vector.shape_cast %70 : vector<1xf32> to vector<1x1x1xf32>
    %72 = vector.extract %71[0, 0, 0] : f32 from vector<1x1x1xf32>
    %73 = vector.broadcast %72 : f32 to vector<1x1xf32>
    %74 = arith.addf %23, %73 : vector<1x1xf32>
    %c1_i32 = arith.constant 1 : i32
    %75 = arith.addi %1, %c1_i32 : i32
    %76 = arith.index_cast %c1_i32 : i32 to index
    %c0_29 = arith.constant 0 : index
    %77 = vector.load %arg8[%76, %c0_29] : memref<8x8xf32, #tpu.memory_space<vmem>>, vector<1x8xf32>
    %78 = arith.index_cast %75 : i32 to index
    %c0_30 = arith.constant 0 : index
    %79 = vector.load %arg5[%78, %c0_30] : memref<8x32xf32, #tpu.memory_space<vmem>>, vector<1x32xf32>
    %cst_31 = arith.constant dense<0.000000e+00> : vector<8x1xf32>
    %80 = tpu.matmul %2, %79, %cst_31 {dimension_numbers = #tpu.dot_dimension_numbers<[1], [1], [0], [0], [0, 0, 1, 0], [], []>} : vector<8x32xf32>, vector<1x32xf32>, vector<8x1xf32> -> vector<8x1xf32>
    %81 = arith.index_cast %75 : i32 to index
    %c0_32 = arith.constant 0 : index
    %82 = vector.load %arg4[%81, %c0_32] : memref<8x1xf32, #tpu.memory_space<vmem>>, vector<1x1xf32>
    %cst_33 = arith.constant 2.000000e+00 : f32
    %83 = vector.broadcast %cst_33 : f32 to vector<8x1xf32>
    %84 = arith.mulf %83, %80 : vector<8x1xf32>
    %85 = vector.broadcast %82 : vector<1x1xf32> to vector<8x1xf32>
    %86 = arith.subf %85, %84 : vector<8x1xf32>
    %87 = arith.addf %86, %4 : vector<8x1xf32>
    %cst_34 = arith.constant 0.000000e+00 : f32
    %88 = vector.broadcast %cst_34 : f32 to vector<8x1xf32>
    %89 = arith.maximumf %87, %88 : vector<8x1xf32>
    %90 = arith.index_cast %75 : i32 to index
    %c0_35 = arith.constant 0 : index
    %91 = vector.load %arg2[%90, %c0_35] : memref<8x1xi32, #tpu.memory_space<vmem>>, vector<1x1xi32>
    %92 = vector.broadcast %91 : vector<1x1xi32> to vector<8x1xi32>
    %93 = arith.cmpi eq, %6, %92 : vector<8x1xi32>
    %94 = vector.broadcast %75 : i32 to vector<8x1xi32>
    %95 = arith.cmpi ne, %21, %94 : vector<8x1xi32>
    %96 = arith.andi %93, %95 : vector<8x1xi1>
    %97 = vector.broadcast %91 : vector<1x1xi32> to vector<1x8xi32>
    %98 = arith.cmpi ne, %5, %97 : vector<1x8xi32>
    %cst_36 = arith.constant 5.000000e-01 : f32
    %99 = vector.broadcast %cst_36 : f32 to vector<8x1xf32>
    %100 = arith.addf %89, %99 : vector<8x1xf32>
    %101 = vector.broadcast %100 : vector<8x1xf32> to vector<8x8xf32>
    %102 = vector.broadcast %77 : vector<1x8xf32> to vector<8x8xf32>
    %103 = arith.subf %101, %102 : vector<8x8xf32>
    %104 = vector.broadcast %96 : vector<8x1xi1> to vector<8x8xi1>
    %105 = vector.broadcast %98 : vector<1x8xi1> to vector<8x8xi1>
    %106 = arith.andi %104, %105 : vector<8x8xi1>
    %cst_37 = arith.constant 0.000000e+00 : f32
    %107 = vector.broadcast %cst_37 : f32 to vector<8x8xf32>
    %108 = arith.cmpf ogt, %103, %107 : vector<8x8xf32>
    %109 = arith.andi %106, %108 : vector<8x8xi1>
    %cst_38 = arith.constant 0.000000e+00 : f32
    %110 = vector.broadcast %cst_38 : f32 to vector<8x8xf32>
    %111 = arith.select %109, %103, %110 : vector<8x8xi1>, vector<8x8xf32>
    %112 = vector.shape_cast %111 : vector<8x8xf32> to vector<1x8x8xf32>
    %cst_39 = arith.constant dense<0.000000e+00> : vector<1xf32>
    %113 = vector.multi_reduction <add>, %112, %cst_39 [1, 2] : vector<1x8x8xf32> to vector<1xf32>
    %114 = vector.shape_cast %113 : vector<1xf32> to vector<1x1x1xf32>
    %115 = vector.extract %114[0, 0, 0] : f32 from vector<1x1x1xf32>
    %116 = vector.broadcast %115 : f32 to vector<1x1xf32>
    %117 = arith.addf %66, %116 : vector<1x1xf32>
    %118 = arith.extui %109 : vector<8x8xi1> to vector<8x8xi32>
    %119 = arith.sitofp %118 : vector<8x8xi32> to vector<8x8xf32>
    %120 = vector.shape_cast %119 : vector<8x8xf32> to vector<1x8x8xf32>
    %cst_40 = arith.constant dense<0.000000e+00> : vector<1xf32>
    %121 = vector.multi_reduction <add>, %120, %cst_40 [1, 2] : vector<1x8x8xf32> to vector<1xf32>
    %122 = vector.shape_cast %121 : vector<1xf32> to vector<1x1x1xf32>
    %123 = vector.extract %122[0, 0, 0] : f32 from vector<1x1x1xf32>
    %124 = vector.broadcast %123 : f32 to vector<1x1xf32>
    %125 = arith.addf %74, %124 : vector<1x1xf32>
    %c2_i32 = arith.constant 2 : i32
    %126 = arith.addi %1, %c2_i32 : i32
    %127 = arith.index_cast %c2_i32 : i32 to index
    %c0_41 = arith.constant 0 : index
    %128 = vector.load %arg8[%127, %c0_41] : memref<8x8xf32, #tpu.memory_space<vmem>>, vector<1x8xf32>
    %129 = arith.index_cast %126 : i32 to index
    %c0_42 = arith.constant 0 : index
    %130 = vector.load %arg5[%129, %c0_42] : memref<8x32xf32, #tpu.memory_space<vmem>>, vector<1x32xf32>
    %cst_43 = arith.constant dense<0.000000e+00> : vector<8x1xf32>
    %131 = tpu.matmul %2, %130, %cst_43 {dimension_numbers = #tpu.dot_dimension_numbers<[1], [1], [0], [0], [0, 0, 1, 0], [], []>} : vector<8x32xf32>, vector<1x32xf32>, vector<8x1xf32> -> vector<8x1xf32>
    %132 = arith.index_cast %126 : i32 to index
    %c0_44 = arith.constant 0 : index
    %133 = vector.load %arg4[%132, %c0_44] : memref<8x1xf32, #tpu.memory_space<vmem>>, vector<1x1xf32>
    %cst_45 = arith.constant 2.000000e+00 : f32
    %134 = vector.broadcast %cst_45 : f32 to vector<8x1xf32>
    %135 = arith.mulf %134, %131 : vector<8x1xf32>
    %136 = vector.broadcast %133 : vector<1x1xf32> to vector<8x1xf32>
    %137 = arith.subf %136, %135 : vector<8x1xf32>
    %138 = arith.addf %137, %4 : vector<8x1xf32>
    %cst_46 = arith.constant 0.000000e+00 : f32
    %139 = vector.broadcast %cst_46 : f32 to vector<8x1xf32>
    %140 = arith.maximumf %138, %139 : vector<8x1xf32>
    %141 = arith.index_cast %126 : i32 to index
    %c0_47 = arith.constant 0 : index
    %142 = vector.load %arg2[%141, %c0_47] : memref<8x1xi32, #tpu.memory_space<vmem>>, vector<1x1xi32>
    %143 = vector.broadcast %142 : vector<1x1xi32> to vector<8x1xi32>
    %144 = arith.cmpi eq, %6, %143 : vector<8x1xi32>
    %145 = vector.broadcast %126 : i32 to vector<8x1xi32>
    %146 = arith.cmpi ne, %21, %145 : vector<8x1xi32>
    %147 = arith.andi %144, %146 : vector<8x1xi1>
    %148 = vector.broadcast %142 : vector<1x1xi32> to vector<1x8xi32>
    %149 = arith.cmpi ne, %5, %148 : vector<1x8xi32>
    %cst_48 = arith.constant 5.000000e-01 : f32
    %150 = vector.broadcast %cst_48 : f32 to vector<8x1xf32>
    %151 = arith.addf %140, %150 : vector<8x1xf32>
    %152 = vector.broadcast %151 : vector<8x1xf32> to vector<8x8xf32>
    %153 = vector.broadcast %128 : vector<1x8xf32> to vector<8x8xf32>
    %154 = arith.subf %152, %153 : vector<8x8xf32>
    %155 = vector.broadcast %147 : vector<8x1xi1> to vector<8x8xi1>
    %156 = vector.broadcast %149 : vector<1x8xi1> to vector<8x8xi1>
    %157 = arith.andi %155, %156 : vector<8x8xi1>
    %cst_49 = arith.constant 0.000000e+00 : f32
    %158 = vector.broadcast %cst_49 : f32 to vector<8x8xf32>
    %159 = arith.cmpf ogt, %154, %158 : vector<8x8xf32>
    %160 = arith.andi %157, %159 : vector<8x8xi1>
    %cst_50 = arith.constant 0.000000e+00 : f32
    %161 = vector.broadcast %cst_50 : f32 to vector<8x8xf32>
    %162 = arith.select %160, %154, %161 : vector<8x8xi1>, vector<8x8xf32>
    %163 = vector.shape_cast %162 : vector<8x8xf32> to vector<1x8x8xf32>
    %cst_51 = arith.constant dense<0.000000e+00> : vector<1xf32>
    %164 = vector.multi_reduction <add>, %163, %cst_51 [1, 2] : vector<1x8x8xf32> to vector<1xf32>
    %165 = vector.shape_cast %164 : vector<1xf32> to vector<1x1x1xf32>
    %166 = vector.extract %165[0, 0, 0] : f32 from vector<1x1x1xf32>
    %167 = vector.broadcast %166 : f32 to vector<1x1xf32>
    %168 = arith.addf %117, %167 : vector<1x1xf32>
    %169 = arith.extui %160 : vector<8x8xi1> to vector<8x8xi32>
    %170 = arith.sitofp %169 : vector<8x8xi32> to vector<8x8xf32>
    %171 = vector.shape_cast %170 : vector<8x8xf32> to vector<1x8x8xf32>
    %cst_52 = arith.constant dense<0.000000e+00> : vector<1xf32>
    %172 = vector.multi_reduction <add>, %171, %cst_52 [1, 2] : vector<1x8x8xf32> to vector<1xf32>
    %173 = vector.shape_cast %172 : vector<1xf32> to vector<1x1x1xf32>
    %174 = vector.extract %173[0, 0, 0] : f32 from vector<1x1x1xf32>
    %175 = vector.broadcast %174 : f32 to vector<1x1xf32>
    %176 = arith.addf %125, %175 : vector<1x1xf32>
    %c3_i32 = arith.constant 3 : i32
    %177 = arith.addi %1, %c3_i32 : i32
    %178 = arith.index_cast %c3_i32 : i32 to index
    %c0_53 = arith.constant 0 : index
    %179 = vector.load %arg8[%178, %c0_53] : memref<8x8xf32, #tpu.memory_space<vmem>>, vector<1x8xf32>
    %180 = arith.index_cast %177 : i32 to index
    %c0_54 = arith.constant 0 : index
    %181 = vector.load %arg5[%180, %c0_54] : memref<8x32xf32, #tpu.memory_space<vmem>>, vector<1x32xf32>
    %cst_55 = arith.constant dense<0.000000e+00> : vector<8x1xf32>
    %182 = tpu.matmul %2, %181, %cst_55 {dimension_numbers = #tpu.dot_dimension_numbers<[1], [1], [0], [0], [0, 0, 1, 0], [], []>} : vector<8x32xf32>, vector<1x32xf32>, vector<8x1xf32> -> vector<8x1xf32>
    %183 = arith.index_cast %177 : i32 to index
    %c0_56 = arith.constant 0 : index
    %184 = vector.load %arg4[%183, %c0_56] : memref<8x1xf32, #tpu.memory_space<vmem>>, vector<1x1xf32>
    %cst_57 = arith.constant 2.000000e+00 : f32
    %185 = vector.broadcast %cst_57 : f32 to vector<8x1xf32>
    %186 = arith.mulf %185, %182 : vector<8x1xf32>
    %187 = vector.broadcast %184 : vector<1x1xf32> to vector<8x1xf32>
    %188 = arith.subf %187, %186 : vector<8x1xf32>
    %189 = arith.addf %188, %4 : vector<8x1xf32>
    %cst_58 = arith.constant 0.000000e+00 : f32
    %190 = vector.broadcast %cst_58 : f32 to vector<8x1xf32>
    %191 = arith.maximumf %189, %190 : vector<8x1xf32>
    %192 = arith.index_cast %177 : i32 to index
    %c0_59 = arith.constant 0 : index
    %193 = vector.load %arg2[%192, %c0_59] : memref<8x1xi32, #tpu.memory_space<vmem>>, vector<1x1xi32>
    %194 = vector.broadcast %193 : vector<1x1xi32> to vector<8x1xi32>
    %195 = arith.cmpi eq, %6, %194 : vector<8x1xi32>
    %196 = vector.broadcast %177 : i32 to vector<8x1xi32>
    %197 = arith.cmpi ne, %21, %196 : vector<8x1xi32>
    %198 = arith.andi %195, %197 : vector<8x1xi1>
    %199 = vector.broadcast %193 : vector<1x1xi32> to vector<1x8xi32>
    %200 = arith.cmpi ne, %5, %199 : vector<1x8xi32>
    %cst_60 = arith.constant 5.000000e-01 : f32
    %201 = vector.broadcast %cst_60 : f32 to vector<8x1xf32>
    %202 = arith.addf %191, %201 : vector<8x1xf32>
    %203 = vector.broadcast %202 : vector<8x1xf32> to vector<8x8xf32>
    %204 = vector.broadcast %179 : vector<1x8xf32> to vector<8x8xf32>
    %205 = arith.subf %203, %204 : vector<8x8xf32>
    %206 = vector.broadcast %198 : vector<8x1xi1> to vector<8x8xi1>
    %207 = vector.broadcast %200 : vector<1x8xi1> to vector<8x8xi1>
    %208 = arith.andi %206, %207 : vector<8x8xi1>
    %cst_61 = arith.constant 0.000000e+00 : f32
    %209 = vector.broadcast %cst_61 : f32 to vector<8x8xf32>
    %210 = arith.cmpf ogt, %205, %209 : vector<8x8xf32>
    %211 = arith.andi %208, %210 : vector<8x8xi1>
    %cst_62 = arith.constant 0.000000e+00 : f32
    %212 = vector.broadcast %cst_62 : f32 to vector<8x8xf32>
    %213 = arith.select %211, %205, %212 : vector<8x8xi1>, vector<8x8xf32>
    %214 = vector.shape_cast %213 : vector<8x8xf32> to vector<1x8x8xf32>
    %cst_63 = arith.constant dense<0.000000e+00> : vector<1xf32>
    %215 = vector.multi_reduction <add>, %214, %cst_63 [1, 2] : vector<1x8x8xf32> to vector<1xf32>
    %216 = vector.shape_cast %215 : vector<1xf32> to vector<1x1x1xf32>
    %217 = vector.extract %216[0, 0, 0] : f32 from vector<1x1x1xf32>
    %218 = vector.broadcast %217 : f32 to vector<1x1xf32>
    %219 = arith.addf %168, %218 : vector<1x1xf32>
    %220 = arith.extui %211 : vector<8x8xi1> to vector<8x8xi32>
    %221 = arith.sitofp %220 : vector<8x8xi32> to vector<8x8xf32>
    %222 = vector.shape_cast %221 : vector<8x8xf32> to vector<1x8x8xf32>
    %cst_64 = arith.constant dense<0.000000e+00> : vector<1xf32>
    %223 = vector.multi_reduction <add>, %222, %cst_64 [1, 2] : vector<1x8x8xf32> to vector<1xf32>
    %224 = vector.shape_cast %223 : vector<1xf32> to vector<1x1x1xf32>
    %225 = vector.extract %224[0, 0, 0] : f32 from vector<1x1x1xf32>
    %226 = vector.broadcast %225 : f32 to vector<1x1xf32>
    %227 = arith.addf %176, %226 : vector<1x1xf32>
    %c4_i32 = arith.constant 4 : i32
    %228 = arith.addi %1, %c4_i32 : i32
    %229 = arith.index_cast %c4_i32 : i32 to index
    %c0_65 = arith.constant 0 : index
    %230 = vector.load %arg8[%229, %c0_65] : memref<8x8xf32, #tpu.memory_space<vmem>>, vector<1x8xf32>
    %231 = arith.index_cast %228 : i32 to index
    %c0_66 = arith.constant 0 : index
    %232 = vector.load %arg5[%231, %c0_66] : memref<8x32xf32, #tpu.memory_space<vmem>>, vector<1x32xf32>
    %cst_67 = arith.constant dense<0.000000e+00> : vector<8x1xf32>
    %233 = tpu.matmul %2, %232, %cst_67 {dimension_numbers = #tpu.dot_dimension_numbers<[1], [1], [0], [0], [0, 0, 1, 0], [], []>} : vector<8x32xf32>, vector<1x32xf32>, vector<8x1xf32> -> vector<8x1xf32>
    %234 = arith.index_cast %228 : i32 to index
    %c0_68 = arith.constant 0 : index
    %235 = vector.load %arg4[%234, %c0_68] : memref<8x1xf32, #tpu.memory_space<vmem>>, vector<1x1xf32>
    %cst_69 = arith.constant 2.000000e+00 : f32
    %236 = vector.broadcast %cst_69 : f32 to vector<8x1xf32>
    %237 = arith.mulf %236, %233 : vector<8x1xf32>
    %238 = vector.broadcast %235 : vector<1x1xf32> to vector<8x1xf32>
    %239 = arith.subf %238, %237 : vector<8x1xf32>
    %240 = arith.addf %239, %4 : vector<8x1xf32>
    %cst_70 = arith.constant 0.000000e+00 : f32
    %241 = vector.broadcast %cst_70 : f32 to vector<8x1xf32>
    %242 = arith.maximumf %240, %241 : vector<8x1xf32>
    %243 = arith.index_cast %228 : i32 to index
    %c0_71 = arith.constant 0 : index
    %244 = vector.load %arg2[%243, %c0_71] : memref<8x1xi32, #tpu.memory_space<vmem>>, vector<1x1xi32>
    %245 = vector.broadcast %244 : vector<1x1xi32> to vector<8x1xi32>
    %246 = arith.cmpi eq, %6, %245 : vector<8x1xi32>
    %247 = vector.broadcast %228 : i32 to vector<8x1xi32>
    %248 = arith.cmpi ne, %21, %247 : vector<8x1xi32>
    %249 = arith.andi %246, %248 : vector<8x1xi1>
    %250 = vector.broadcast %244 : vector<1x1xi32> to vector<1x8xi32>
    %251 = arith.cmpi ne, %5, %250 : vector<1x8xi32>
    %cst_72 = arith.constant 5.000000e-01 : f32
    %252 = vector.broadcast %cst_72 : f32 to vector<8x1xf32>
    %253 = arith.addf %242, %252 : vector<8x1xf32>
    %254 = vector.broadcast %253 : vector<8x1xf32> to vector<8x8xf32>
    %255 = vector.broadcast %230 : vector<1x8xf32> to vector<8x8xf32>
    %256 = arith.subf %254, %255 : vector<8x8xf32>
    %257 = vector.broadcast %249 : vector<8x1xi1> to vector<8x8xi1>
    %258 = vector.broadcast %251 : vector<1x8xi1> to vector<8x8xi1>
    %259 = arith.andi %257, %258 : vector<8x8xi1>
    %cst_73 = arith.constant 0.000000e+00 : f32
    %260 = vector.broadcast %cst_73 : f32 to vector<8x8xf32>
    %261 = arith.cmpf ogt, %256, %260 : vector<8x8xf32>
    %262 = arith.andi %259, %261 : vector<8x8xi1>
    %cst_74 = arith.constant 0.000000e+00 : f32
    %263 = vector.broadcast %cst_74 : f32 to vector<8x8xf32>
    %264 = arith.select %262, %256, %263 : vector<8x8xi1>, vector<8x8xf32>
    %265 = vector.shape_cast %264 : vector<8x8xf32> to vector<1x8x8xf32>
    %cst_75 = arith.constant dense<0.000000e+00> : vector<1xf32>
    %266 = vector.multi_reduction <add>, %265, %cst_75 [1, 2] : vector<1x8x8xf32> to vector<1xf32>
    %267 = vector.shape_cast %266 : vector<1xf32> to vector<1x1x1xf32>
    %268 = vector.extract %267[0, 0, 0] : f32 from vector<1x1x1xf32>
    %269 = vector.broadcast %268 : f32 to vector<1x1xf32>
    %270 = arith.addf %219, %269 : vector<1x1xf32>
    %271 = arith.extui %262 : vector<8x8xi1> to vector<8x8xi32>
    %272 = arith.sitofp %271 : vector<8x8xi32> to vector<8x8xf32>
    %273 = vector.shape_cast %272 : vector<8x8xf32> to vector<1x8x8xf32>
    %cst_76 = arith.constant dense<0.000000e+00> : vector<1xf32>
    %274 = vector.multi_reduction <add>, %273, %cst_76 [1, 2] : vector<1x8x8xf32> to vector<1xf32>
    %275 = vector.shape_cast %274 : vector<1xf32> to vector<1x1x1xf32>
    %276 = vector.extract %275[0, 0, 0] : f32 from vector<1x1x1xf32>
    %277 = vector.broadcast %276 : f32 to vector<1x1xf32>
    %278 = arith.addf %227, %277 : vector<1x1xf32>
    %c5_i32 = arith.constant 5 : i32
    %279 = arith.addi %1, %c5_i32 : i32
    %280 = arith.index_cast %c5_i32 : i32 to index
    %c0_77 = arith.constant 0 : index
    %281 = vector.load %arg8[%280, %c0_77] : memref<8x8xf32, #tpu.memory_space<vmem>>, vector<1x8xf32>
    %282 = arith.index_cast %279 : i32 to index
    %c0_78 = arith.constant 0 : index
    %283 = vector.load %arg5[%282, %c0_78] : memref<8x32xf32, #tpu.memory_space<vmem>>, vector<1x32xf32>
    %cst_79 = arith.constant dense<0.000000e+00> : vector<8x1xf32>
    %284 = tpu.matmul %2, %283, %cst_79 {dimension_numbers = #tpu.dot_dimension_numbers<[1], [1], [0], [0], [0, 0, 1, 0], [], []>} : vector<8x32xf32>, vector<1x32xf32>, vector<8x1xf32> -> vector<8x1xf32>
    %285 = arith.index_cast %279 : i32 to index
    %c0_80 = arith.constant 0 : index
    %286 = vector.load %arg4[%285, %c0_80] : memref<8x1xf32, #tpu.memory_space<vmem>>, vector<1x1xf32>
    %cst_81 = arith.constant 2.000000e+00 : f32
    %287 = vector.broadcast %cst_81 : f32 to vector<8x1xf32>
    %288 = arith.mulf %287, %284 : vector<8x1xf32>
    %289 = vector.broadcast %286 : vector<1x1xf32> to vector<8x1xf32>
    %290 = arith.subf %289, %288 : vector<8x1xf32>
    %291 = arith.addf %290, %4 : vector<8x1xf32>
    %cst_82 = arith.constant 0.000000e+00 : f32
    %292 = vector.broadcast %cst_82 : f32 to vector<8x1xf32>
    %293 = arith.maximumf %291, %292 : vector<8x1xf32>
    %294 = arith.index_cast %279 : i32 to index
    %c0_83 = arith.constant 0 : index
    %295 = vector.load %arg2[%294, %c0_83] : memref<8x1xi32, #tpu.memory_space<vmem>>, vector<1x1xi32>
    %296 = vector.broadcast %295 : vector<1x1xi32> to vector<8x1xi32>
    %297 = arith.cmpi eq, %6, %296 : vector<8x1xi32>
    %298 = vector.broadcast %279 : i32 to vector<8x1xi32>
    %299 = arith.cmpi ne, %21, %298 : vector<8x1xi32>
    %300 = arith.andi %297, %299 : vector<8x1xi1>
    %301 = vector.broadcast %295 : vector<1x1xi32> to vector<1x8xi32>
    %302 = arith.cmpi ne, %5, %301 : vector<1x8xi32>
    %cst_84 = arith.constant 5.000000e-01 : f32
    %303 = vector.broadcast %cst_84 : f32 to vector<8x1xf32>
    %304 = arith.addf %293, %303 : vector<8x1xf32>
    %305 = vector.broadcast %304 : vector<8x1xf32> to vector<8x8xf32>
    %306 = vector.broadcast %281 : vector<1x8xf32> to vector<8x8xf32>
    %307 = arith.subf %305, %306 : vector<8x8xf32>
    %308 = vector.broadcast %300 : vector<8x1xi1> to vector<8x8xi1>
    %309 = vector.broadcast %302 : vector<1x8xi1> to vector<8x8xi1>
    %310 = arith.andi %308, %309 : vector<8x8xi1>
    %cst_85 = arith.constant 0.000000e+00 : f32
    %311 = vector.broadcast %cst_85 : f32 to vector<8x8xf32>
    %312 = arith.cmpf ogt, %307, %311 : vector<8x8xf32>
    %313 = arith.andi %310, %312 : vector<8x8xi1>
    %cst_86 = arith.constant 0.000000e+00 : f32
    %314 = vector.broadcast %cst_86 : f32 to vector<8x8xf32>
    %315 = arith.select %313, %307, %314 : vector<8x8xi1>, vector<8x8xf32>
    %316 = vector.shape_cast %315 : vector<8x8xf32> to vector<1x8x8xf32>
    %cst_87 = arith.constant dense<0.000000e+00> : vector<1xf32>
    %317 = vector.multi_reduction <add>, %316, %cst_87 [1, 2] : vector<1x8x8xf32> to vector<1xf32>
    %318 = vector.shape_cast %317 : vector<1xf32> to vector<1x1x1xf32>
    %319 = vector.extract %318[0, 0, 0] : f32 from vector<1x1x1xf32>
    %320 = vector.broadcast %319 : f32 to vector<1x1xf32>
    %321 = arith.addf %270, %320 : vector<1x1xf32>
    %322 = arith.extui %313 : vector<8x8xi1> to vector<8x8xi32>
    %323 = arith.sitofp %322 : vector<8x8xi32> to vector<8x8xf32>
    %324 = vector.shape_cast %323 : vector<8x8xf32> to vector<1x8x8xf32>
    %cst_88 = arith.constant dense<0.000000e+00> : vector<1xf32>
    %325 = vector.multi_reduction <add>, %324, %cst_88 [1, 2] : vector<1x8x8xf32> to vector<1xf32>
    %326 = vector.shape_cast %325 : vector<1xf32> to vector<1x1x1xf32>
    %327 = vector.extract %326[0, 0, 0] : f32 from vector<1x1x1xf32>
    %328 = vector.broadcast %327 : f32 to vector<1x1xf32>
    %329 = arith.addf %278, %328 : vector<1x1xf32>
    %c6_i32 = arith.constant 6 : i32
    %330 = arith.addi %1, %c6_i32 : i32
    %331 = arith.index_cast %c6_i32 : i32 to index
    %c0_89 = arith.constant 0 : index
    %332 = vector.load %arg8[%331, %c0_89] : memref<8x8xf32, #tpu.memory_space<vmem>>, vector<1x8xf32>
    %333 = arith.index_cast %330 : i32 to index
    %c0_90 = arith.constant 0 : index
    %334 = vector.load %arg5[%333, %c0_90] : memref<8x32xf32, #tpu.memory_space<vmem>>, vector<1x32xf32>
    %cst_91 = arith.constant dense<0.000000e+00> : vector<8x1xf32>
    %335 = tpu.matmul %2, %334, %cst_91 {dimension_numbers = #tpu.dot_dimension_numbers<[1], [1], [0], [0], [0, 0, 1, 0], [], []>} : vector<8x32xf32>, vector<1x32xf32>, vector<8x1xf32> -> vector<8x1xf32>
    %336 = arith.index_cast %330 : i32 to index
    %c0_92 = arith.constant 0 : index
    %337 = vector.load %arg4[%336, %c0_92] : memref<8x1xf32, #tpu.memory_space<vmem>>, vector<1x1xf32>
    %cst_93 = arith.constant 2.000000e+00 : f32
    %338 = vector.broadcast %cst_93 : f32 to vector<8x1xf32>
    %339 = arith.mulf %338, %335 : vector<8x1xf32>
    %340 = vector.broadcast %337 : vector<1x1xf32> to vector<8x1xf32>
    %341 = arith.subf %340, %339 : vector<8x1xf32>
    %342 = arith.addf %341, %4 : vector<8x1xf32>
    %cst_94 = arith.constant 0.000000e+00 : f32
    %343 = vector.broadcast %cst_94 : f32 to vector<8x1xf32>
    %344 = arith.maximumf %342, %343 : vector<8x1xf32>
    %345 = arith.index_cast %330 : i32 to index
    %c0_95 = arith.constant 0 : index
    %346 = vector.load %arg2[%345, %c0_95] : memref<8x1xi32, #tpu.memory_space<vmem>>, vector<1x1xi32>
    %347 = vector.broadcast %346 : vector<1x1xi32> to vector<8x1xi32>
    %348 = arith.cmpi eq, %6, %347 : vector<8x1xi32>
    %349 = vector.broadcast %330 : i32 to vector<8x1xi32>
    %350 = arith.cmpi ne, %21, %349 : vector<8x1xi32>
    %351 = arith.andi %348, %350 : vector<8x1xi1>
    %352 = vector.broadcast %346 : vector<1x1xi32> to vector<1x8xi32>
    %353 = arith.cmpi ne, %5, %352 : vector<1x8xi32>
    %cst_96 = arith.constant 5.000000e-01 : f32
    %354 = vector.broadcast %cst_96 : f32 to vector<8x1xf32>
    %355 = arith.addf %344, %354 : vector<8x1xf32>
    %356 = vector.broadcast %355 : vector<8x1xf32> to vector<8x8xf32>
    %357 = vector.broadcast %332 : vector<1x8xf32> to vector<8x8xf32>
    %358 = arith.subf %356, %357 : vector<8x8xf32>
    %359 = vector.broadcast %351 : vector<8x1xi1> to vector<8x8xi1>
    %360 = vector.broadcast %353 : vector<1x8xi1> to vector<8x8xi1>
    %361 = arith.andi %359, %360 : vector<8x8xi1>
    %cst_97 = arith.constant 0.000000e+00 : f32
    %362 = vector.broadcast %cst_97 : f32 to vector<8x8xf32>
    %363 = arith.cmpf ogt, %358, %362 : vector<8x8xf32>
    %364 = arith.andi %361, %363 : vector<8x8xi1>
    %cst_98 = arith.constant 0.000000e+00 : f32
    %365 = vector.broadcast %cst_98 : f32 to vector<8x8xf32>
    %366 = arith.select %364, %358, %365 : vector<8x8xi1>, vector<8x8xf32>
    %367 = vector.shape_cast %366 : vector<8x8xf32> to vector<1x8x8xf32>
    %cst_99 = arith.constant dense<0.000000e+00> : vector<1xf32>
    %368 = vector.multi_reduction <add>, %367, %cst_99 [1, 2] : vector<1x8x8xf32> to vector<1xf32>
    %369 = vector.shape_cast %368 : vector<1xf32> to vector<1x1x1xf32>
    %370 = vector.extract %369[0, 0, 0] : f32 from vector<1x1x1xf32>
    %371 = vector.broadcast %370 : f32 to vector<1x1xf32>
    %372 = arith.addf %321, %371 : vector<1x1xf32>
    %373 = arith.extui %364 : vector<8x8xi1> to vector<8x8xi32>
    %374 = arith.sitofp %373 : vector<8x8xi32> to vector<8x8xf32>
    %375 = vector.shape_cast %374 : vector<8x8xf32> to vector<1x8x8xf32>
    %cst_100 = arith.constant dense<0.000000e+00> : vector<1xf32>
    %376 = vector.multi_reduction <add>, %375, %cst_100 [1, 2] : vector<1x8x8xf32> to vector<1xf32>
    %377 = vector.shape_cast %376 : vector<1xf32> to vector<1x1x1xf32>
    %378 = vector.extract %377[0, 0, 0] : f32 from vector<1x1x1xf32>
    %379 = vector.broadcast %378 : f32 to vector<1x1xf32>
    %380 = arith.addf %329, %379 : vector<1x1xf32>
    %c7_i32 = arith.constant 7 : i32
    %381 = arith.addi %1, %c7_i32 : i32
    %382 = arith.index_cast %c7_i32 : i32 to index
    %c0_101 = arith.constant 0 : index
    %383 = vector.load %arg8[%382, %c0_101] : memref<8x8xf32, #tpu.memory_space<vmem>>, vector<1x8xf32>
    %384 = arith.index_cast %381 : i32 to index
    %c0_102 = arith.constant 0 : index
    %385 = vector.load %arg5[%384, %c0_102] : memref<8x32xf32, #tpu.memory_space<vmem>>, vector<1x32xf32>
    %cst_103 = arith.constant dense<0.000000e+00> : vector<8x1xf32>
    %386 = tpu.matmul %2, %385, %cst_103 {dimension_numbers = #tpu.dot_dimension_numbers<[1], [1], [0], [0], [0, 0, 1, 0], [], []>} : vector<8x32xf32>, vector<1x32xf32>, vector<8x1xf32> -> vector<8x1xf32>
    %387 = arith.index_cast %381 : i32 to index
    %c0_104 = arith.constant 0 : index
    %388 = vector.load %arg4[%387, %c0_104] : memref<8x1xf32, #tpu.memory_space<vmem>>, vector<1x1xf32>
    %cst_105 = arith.constant 2.000000e+00 : f32
    %389 = vector.broadcast %cst_105 : f32 to vector<8x1xf32>
    %390 = arith.mulf %389, %386 : vector<8x1xf32>
    %391 = vector.broadcast %388 : vector<1x1xf32> to vector<8x1xf32>
    %392 = arith.subf %391, %390 : vector<8x1xf32>
    %393 = arith.addf %392, %4 : vector<8x1xf32>
    %cst_106 = arith.constant 0.000000e+00 : f32
    %394 = vector.broadcast %cst_106 : f32 to vector<8x1xf32>
    %395 = arith.maximumf %393, %394 : vector<8x1xf32>
    %396 = arith.index_cast %381 : i32 to index
    %c0_107 = arith.constant 0 : index
    %397 = vector.load %arg2[%396, %c0_107] : memref<8x1xi32, #tpu.memory_space<vmem>>, vector<1x1xi32>
    %398 = vector.broadcast %397 : vector<1x1xi32> to vector<8x1xi32>
    %399 = arith.cmpi eq, %6, %398 : vector<8x1xi32>
    %400 = vector.broadcast %381 : i32 to vector<8x1xi32>
    %401 = arith.cmpi ne, %21, %400 : vector<8x1xi32>
    %402 = arith.andi %399, %401 : vector<8x1xi1>
    %403 = vector.broadcast %397 : vector<1x1xi32> to vector<1x8xi32>
    %404 = arith.cmpi ne, %5, %403 : vector<1x8xi32>
    %cst_108 = arith.constant 5.000000e-01 : f32
    %405 = vector.broadcast %cst_108 : f32 to vector<8x1xf32>
    %406 = arith.addf %395, %405 : vector<8x1xf32>
    %407 = vector.broadcast %406 : vector<8x1xf32> to vector<8x8xf32>
    %408 = vector.broadcast %383 : vector<1x8xf32> to vector<8x8xf32>
    %409 = arith.subf %407, %408 : vector<8x8xf32>
    %410 = vector.broadcast %402 : vector<8x1xi1> to vector<8x8xi1>
    %411 = vector.broadcast %404 : vector<1x8xi1> to vector<8x8xi1>
    %412 = arith.andi %410, %411 : vector<8x8xi1>
    %cst_109 = arith.constant 0.000000e+00 : f32
    %413 = vector.broadcast %cst_109 : f32 to vector<8x8xf32>
    %414 = arith.cmpf ogt, %409, %413 : vector<8x8xf32>
    %415 = arith.andi %412, %414 : vector<8x8xi1>
    %cst_110 = arith.constant 0.000000e+00 : f32
    %416 = vector.broadcast %cst_110 : f32 to vector<8x8xf32>
    %417 = arith.select %415, %409, %416 : vector<8x8xi1>, vector<8x8xf32>
    %418 = vector.shape_cast %417 : vector<8x8xf32> to vector<1x8x8xf32>
    %cst_111 = arith.constant dense<0.000000e+00> : vector<1xf32>
    %419 = vector.multi_reduction <add>, %418, %cst_111 [1, 2] : vector<1x8x8xf32> to vector<1xf32>
    %420 = vector.shape_cast %419 : vector<1xf32> to vector<1x1x1xf32>
    %421 = vector.extract %420[0, 0, 0] : f32 from vector<1x1x1xf32>
    %422 = vector.broadcast %421 : f32 to vector<1x1xf32>
    %423 = arith.addf %372, %422 : vector<1x1xf32>
    %424 = arith.extui %415 : vector<8x8xi1> to vector<8x8xi32>
    %425 = arith.sitofp %424 : vector<8x8xi32> to vector<8x8xf32>
    %426 = vector.shape_cast %425 : vector<8x8xf32> to vector<1x8x8xf32>
    %cst_112 = arith.constant dense<0.000000e+00> : vector<1xf32>
    %427 = vector.multi_reduction <add>, %426, %cst_112 [1, 2] : vector<1x8x8xf32> to vector<1xf32>
    %428 = vector.shape_cast %427 : vector<1xf32> to vector<1x1x1xf32>
    %429 = vector.extract %428[0, 0, 0] : f32 from vector<1x1x1xf32>
    %430 = vector.broadcast %429 : f32 to vector<1x1xf32>
    %431 = arith.addf %380, %430 : vector<1x1xf32>
    %c8_i32_113 = arith.constant 8 : i32
    %432 = vector.shape_cast %423 : vector<1x1xf32> to vector<1x1x1xf32>
    %433 = vector.shape_cast %432 : vector<1x1x1xf32> to vector<1x1x1xf32>
    %434 = vector.broadcast %433 : vector<1x1x1xf32> to vector<1x8x128xf32>
    %c0_114 = arith.constant 0 : index
    %c0_115 = arith.constant 0 : index
    %c0_116 = arith.constant 0 : index
    %435 = vector.load %arg6[%c0_114, %c0_115, %c0_116] : memref<1x8x128xf32, #tpu.memory_space<vmem>>, vector<1x8x128xf32>
    tpu.vector_store %arg6[%c0_114, %c0_115, %c0_116], %434 {strides = array<i32>} : memref<1x8x128xf32, #tpu.memory_space<vmem>>, vector<1x8x128xf32>,
    %436 = vector.shape_cast %431 : vector<1x1xf32> to vector<1x1x1xf32>
    %437 = vector.shape_cast %436 : vector<1x1x1xf32> to vector<1x1x1xf32>
    %438 = vector.broadcast %437 : vector<1x1x1xf32> to vector<1x8x128xf32>
    %c0_117 = arith.constant 0 : index
    %c0_118 = arith.constant 0 : index
    %c0_119 = arith.constant 0 : index
    %439 = vector.load %arg7[%c0_117, %c0_118, %c0_119] : memref<1x8x128xf32, #tpu.memory_space<vmem>>, vector<1x8x128xf32>
    tpu.vector_store %arg7[%c0_117, %c0_118, %c0_119], %438 {strides = array<i32>} : memref<1x8x128xf32, #tpu.memory_space<vmem>>, vector<1x8x128xf32>,
    return
  }
  func.func @transform_0(%arg0: i32) -> (i32, i32) {
    %c0_i32 = arith.constant 0 : i32
    %c0_i32_0 = arith.constant 0 : i32
    %c0_i32_1 = arith.constant 0 : i32
    return %c0_i32, %c0_i32_0 : i32, i32
  }
  func.func @transform_1(%arg0: i32) -> (i32, i32) {
    %c0_i32 = arith.constant 0 : i32
    %c0_i32_0 = arith.constant 0 : i32
    %c0_i32_1 = arith.constant 0 : i32
    return %c0_i32, %c0_i32_0 : i32, i32
  }
  func.func @transform_2(%arg0: i32) -> (i32, i32) {
    %c0_i32 = arith.constant 0 : i32
    %c0_i32_0 = arith.constant 0 : i32
    %c0_i32_1 = arith.constant 0 : i32
    return %c0_i32, %c0_i32_0 : i32, i32
  }
  func.func @transform_3(%arg0: i32) -> (i32, i32) {
    %c0_i32 = arith.constant 0 : i32
    %c0_i32_0 = arith.constant 0 : i32
    %c0_i32_1 = arith.constant 0 : i32
    return %c0_i32, %c0_i32_0 : i32, i32
  }
  func.func @transform_4(%arg0: i32) -> (i32, i32) {
    %c0_i32 = arith.constant 0 : i32
    %c0_i32_0 = arith.constant 0 : i32
    %c0_i32_1 = arith.constant 0 : i32
    return %c0_i32, %c0_i32_0 : i32, i32
  }
  func.func @transform_5(%arg0: i32) -> (i32, i32, i32) {
    %c0_i32 = arith.constant 0 : i32
    %c0_i32_0 = arith.constant 0 : i32
    %c0_i32_1 = arith.constant 0 : i32
    return %arg0, %c0_i32, %c0_i32_0 : i32, i32, i32
  }
  func.func @transform_6(%arg0: i32) -> (i32, i32, i32) {
    %c0_i32 = arith.constant 0 : i32
    %c0_i32_0 = arith.constant 0 : i32
    %c0_i32_1 = arith.constant 0 : i32
    return %arg0, %c0_i32, %c0_i32_0 : i32, i32, i32
  }
}

</mosaic_0001>

<bundles_post_ra>
// kernel: tpu_custom_call.1
= control target key start
LH: loop header
LB: loop body
LE: loop exit
PB: predicated region body
PF: predicated region fallthrough
CT: control target
= control target key end

     0   :  { %12 = vsyncpa [#allocation4], 0  ;;  %vm32_vm0 = vcmask 261120   ;;  %v868_v11 = vmov 0   ;;  %s1148_s0 = inlined_call_operand.vmem [shape: s32[1,8], index: 0, kind: input, shape index: {}]   ;;  %s1149_s1 = inlined_call_operand.vmem [shape: s32[8,1], index: 1, kind: input, shape index: {}]   ;;  %s1150_s2 = inlined_call_operand.vmem [shape: f32[1,8], index: 2, kind: input, shape index: {}]   ;;  %s1151_s3 = inlined_call_operand.vmem [shape: f32[8,1], index: 3, kind: input, shape index: {}]   ;;  %s1152_s4 = inlined_call_operand.vmem [shape: f32[8,32], index: 4, kind: input, shape index: {}]   ;;  %s1153_s5 = inlined_call_operand.hbm [shape: f32[1,8,128], index: 5, kind: output, shape index: {0}]   ;;  %s1154_s6 = inlined_call_operand.hbm [shape: f32[1,8,128], index: 6, kind: output, shape index: {1}]  }
   0x1   :  { %v25_v0 = vld [vmem:[%s1152_s4] sm:$0xff]  ;;  %781 = vset.pattern.permute.xlu0 %v868_v11  ;;  %780 = vset.pattern.permute.xlu2 %v868_v11 }
   0x2   :  { %v783_v1 = vld [vmem:[%s1152_s4 + $0x1] ss:$0 sm:$0xff]  ;;  %v784_v2 = vld [vmem:[%s1152_s4] ss:$0 sm:$0xff]  ;;  %713 = vmatpush.xpose.msk.msra.mxu0 %vm32_vm0, %v25_v0  ;;  %v785_v4 = vld [vmem:[%s1152_s4 + $0x2] ss:$0 sm:$0xff]  ;;  %782 = vset.pattern.permute.xlu1 %v868_v11 }
   0x3   :  { %v152_v3 = vmul.f32 %v783_v1, %v25_v0  ;;  %v80_v5 = vmul.f32 %v784_v2, %v25_v0  ;;  %v786_v6 = vld [vmem:[%s1152_s4 + $0x3] ss:$0 sm:$0xff]  ;;  %v225_v8 = vmul.f32 %v785_v4, %v25_v0  ;;  %v788_v9 = vld [vmem:[%s1152_s4 + $0x5] ss:$0 sm:$0xff]  ;;  %v787_v15 = vld [vmem:[%s1152_s4 + $0x4] ss:$0 sm:$0xff] }
   0x4   :  { %v444_v13 = vmul.f32 %v788_v9, %v25_v0  ;;  %v298_v14 = vmul.f32 %v786_v6, %v25_v0 }
   0x5   :  { %v153_v7 = vsel %vm32_vm0, %v152_v3, 0.0  ;;  %714 = vmatmul.msk.f32.vlgmr.msra.gmra.mxu0 %vm32_vm0, %v25_v0  ;;  %v81_v10 = vsel %vm32_vm0, %v80_v5, 0.0  ;;  %v226_v12 = vsel %vm32_vm0, %v225_v8, 0.0 }
   0x6   :  { %154 = vadd.xlane.f32.xlu2 %v153_v7  ;;  %82 = vadd.xlane.f32.xlu0 %v81_v10  ;;  %v445_v16 = vsel %vm32_vm0, %v444_v13, 0.0  ;;  %v299_v17 = vsel %vm32_vm0, %v298_v14, 0.0 }
   0x7   :  { %227 = vadd.xlane.f32.xlu1 %v226_v12 }
   0x8   :  { %13 = vsyncpa [#allocation6], 0  ;;  %v371_v18 = vmul.f32 %v787_v15, %v25_v0  ;;  %v941_v19 = vld [vmem:[%s1149_s1] sm:$0xff]  ;;  %v75_v20 = vlaneseq  ;;  %s870_s30 = smov [#allocation3]   ;;  %s667_s9 = sshll.u32 %s1153_s5, 4  ;;  %s668_s9 = int_to_ptr.hbm [resolvable:$true] %s667_s9 }
   0x9   :  { %v793_v21 = vld [vmem:[%s1149_s1] ss:$0 sm:$0xff]  ;;  %v789_v23 = vld [vmem:[%s1152_s4 + $0x6] ss:$0 sm:$0xff]  ;;  %v790_v28 = vld [vmem:[%s1152_s4 + $0x7] ss:$0 sm:$0xff] }
   0xa   :  { %v372_v22 = vsel %vm32_vm0, %v371_v18, 0.0  ;;  %v950_v24 = vshrl.u32 %v75_v20, 7  ;;  %vm93_vm1 = vcmp.eq.s32.totalorder %v941_v19, %v793_v21  ;;  %v517_v25 = vmul.f32 %v789_v23, %v25_v0  ;;  %v962_v29 = vld [vmem:[%s1151_s3] sm:$0xff]  ;;  %s665_s7 = sshll.u32 %s870_s30, 4  ;;  %s871_s10 = smov [#allocation5]   ;;  %s666_s7 = int_to_ptr.vmem [resolvable:$true] %s665_s7 }
   0xb   :  { %v590_v30 = vmul.f32 %v790_v28, %v25_v0  ;;  %v794_v31 = vld [vmem:[%s1149_s1 + $0x3] ss:$0 sm:$0xff]  ;;  %v718_v34 = vld [vmem:[%s1149_s1 + $0x1] sm:$0x1]  ;;  %v795_v35 = vld [vmem:[%s1149_s1 + $0x4] ss:$0 sm:$0xff] }
   0xc   :  { %vm95_vm2 = vcmp.ne.s32.totalorder %v950_v24, 0  ;;  %v518_v27 = vsel %vm32_vm0, %v517_v25, 0.0  ;;  %vm314_vm4 = vcmp.ne.s32.totalorder %v950_v24, 3  ;;  %vm312_vm5 = vcmp.eq.s32.totalorder %v941_v19, %v794_v31  ;;  %v730_v36 = vld [vmem:[%s1149_s1 + $0x4] sm:$0x1]  ;;  %s676_s11 = sshll.u32 %s871_s10, 4  ;;  %s677_s11 = int_to_ptr.vmem [resolvable:$true] %s676_s11 }
   0xd   :  { %vm96_vm3 = vmand %vm93_vm1, %vm95_vm2  ;;  %v591_v32 = vsel %vm32_vm0, %v590_v30, 0.0  ;;  %vm385_vm7 = vcmp.eq.s32.totalorder %v941_v19, %v795_v35  ;;  %vm387_vm8 = vcmp.ne.s32.totalorder %v950_v24, 4  ;;  %v722_v37 = vld [vmem:[%s1149_s1 + $0x2] sm:$0x1]  ;;  %v726_v39 = vld [vmem:[%s1149_s1 + $0x3] sm:$0x1] }
   0xe   :  { %446 = vadd.xlane.f32.xlu0 %v445_v16  ;;  %v109_v26 = vsel %vm96_vm3, 1, %v868_v11  ;;  %vm315_vm6 = vmand %vm312_vm5, %vm314_vm4  ;;  %v742_v40 = vld [vmem:[%s1149_s1 + $0x7] sm:$0x1]  ;;  %v91_v41 = vld [vmem:[%s1149_s1] sm:$0x1]  ;;  %vm168_vm11 = vcmp.ne.s32.totalorder %v950_v24, 1 }
   0xf   :  { %300 = vadd.xlane.f32.xlu1 %v299_v17  ;;  %v328_v33 = vsel %vm315_vm6, 1, %v868_v11  ;;  %vm388_vm9 = vmand %vm385_vm7, %vm387_vm8  ;;  %v738_v42 = vld [vmem:[%s1149_s1 + $0x6] sm:$0x1]  ;;  %v798_v43 = vld [vmem:[%s1151_s3 + $0x1] ss:$0 sm:$0xff]  ;;  %vm241_vm14 = vcmp.ne.s32.totalorder %v950_v24, 2 }
  0x10   :  { %v401_v38 = vsel %vm388_vm9, 1, %v868_v11  ;;  %v799_v45 = vld [vmem:[%s1151_s3] ss:$0 sm:$0xff]  ;;  %v800_v48 = vld [vmem:[%s1151_s3 + $0x2] ss:$0 sm:$0xff]  ;;  %vm460_vm2 = vcmp.ne.s32.totalorder %v950_v24, 5 }
  0x11   :  { %v791_v57 = vld [vmem:[%s1149_s1 + $0x1] ss:$0 sm:$0xff]  ;;  %v801_v62 = vld [vmem:[%s1151_s3 + $0x3] ss:$0 sm:$0xff]  ;;  %v792_v5 = vld [vmem:[%s1149_s1 + $0x2] ss:$0 sm:$0xff] }
  0x12   :  { %vm166_vm10 = vcmp.eq.s32.totalorder %v941_v19, %v791_v57  ;;  %v802_v9 = vld [vmem:[%s1151_s3 + $0x4] ss:$0 sm:$0xff]  ;;  %vm239_vm13 = vcmp.eq.s32.totalorder %v941_v19, %v792_v5  ;;  %v803_v20 = vld [vmem:[%s1151_s3 + $0x5] ss:$0 sm:$0xff]  ;;  %v1041_v23 = vld [vmem:[%s1148_s0] sm:$0x1] }
  0x13   :  { %vm169_vm12 = vmand %vm166_vm10, %vm168_vm11  ;;  %v804_v28 = vld [vmem:[%s1149_s1 + $0x5] ss:$0 sm:$0xff]  ;;  %vm73_vm7 = vcmask 64512   ;;  %s678_s14 = sshll.u32 %s1154_s6, 4  ;;  %s679_s14 = int_to_ptr.hbm [resolvable:$true] %s678_s14 }
  0x14   :  { %v182_v8 = vsel %vm169_vm12, 1, %v868_v11  ;;  %vm242_vm15 = vmand %vm239_vm13, %vm241_vm14  ;;  %v734_v35 = vld [vmem:[%s1149_s1 + $0x5] sm:$0x1]  ;;  %vm458_vm1 = vcmp.eq.s32.totalorder %v941_v19, %v804_v28 }
  0x15   :  { %vm461_vm4 = vmand %vm458_vm1, %vm460_vm2 }
  0x17   :  { %373 = vadd.xlane.f32.xlu1 %v372_v22  ;;  %v255_v22 = vsel %vm242_vm15, 1, %v868_v11 }
  0x1e   :  { %111 = vperm.xlu2 %780, %v109_v26  }
  0x1f   :  { %519 = vadd.xlane.f32.xlu1 %v518_v27 }
  0x22   :  { %64 = vperm.xlu0 %781, %v962_v29  }
  0x26   :  { %330 = vperm.xlu2 %780, %v328_v33  }
  0x27   :  { %592 = vadd.xlane.f32.xlu1 %v591_v32 }
  0x2a   :  { %171 = vperm.xlu0 %781, %v718_v34  }
  0x2e   :  { %390 = vperm.xlu2 %780, %v730_v36  }
  0x32   :  { %244 = vperm.xlu0 %781, %v722_v37   ;;  %v807_v37 = vld [vmem:[%s1150_s2] ss:$0 sm:$0xff] }
  0x36   :  { %403 = vperm.xlu2 %780, %v401_v38  }
  0x3a   :  { %317 = vperm.xlu0 %781, %v726_v39  }
  0x3e   :  { %609 = vperm.xlu2 %780, %v742_v40  }
  0x40   :  { %98 = vperm.xlu1 %782, %v91_v41  }
  0x42   :  { %536 = vperm.xlu0 %781, %v738_v42  }
  0x79   :  { %v155_v44 = vpop.xlane.xlu2 %154  ;;  %v83_v47 = vpop.xlane.xlu0 %82 }
  0x7a   :  { %v158_v46 = vmul.f32 2.0, %v155_v44  ;;  %v85_v49 = vmul.f32 2.0, %v83_v47  ;;  %v228_v50 = vpop.xlane.xlu1 %227 }
  0x7b   :  { %v231_v52 = vmul.f32 2.0, %v228_v50 }
  0x7c   :  { %v160_v51 = vsub.f32 %v798_v43, %v158_v46  ;;  %v87_v53 = vsub.f32 %v799_v45, %v85_v49  ;;  %v474_v46 = vsel %vm461_vm4, 1, %v868_v11 }
  0x7d   :  { %v233_v55 = vsub.f32 %v800_v48, %v231_v52 }
  0x7e   :  { %v161_v54 = vadd.f32 %v160_v51, %v962_v29  ;;  %v88_v56 = vadd.f32 %v87_v53, %v962_v29 }
  0x7f   :  { %v234_v58 = vadd.f32 %v233_v55, %v962_v29 }
  0x80   :  { %v162_v59 = vmax.f32 %v161_v54, 0.0  ;;  %v89_v60 = vmax.f32 %v88_v56, 0.0 }
  0x81   :  { %v235_v2 = vmax.f32 %v234_v58, 0.0  ;;  %v1019_v3 = vpop.permute.xlu2 %111  ;;  %v447_v14 = vpop.xlane.xlu0 %446 }
  0x82   :  { %v174_v61 = vadd.f32 0.5, %v162_v59  ;;  %v101_v63 = vadd.f32 0.5, %v89_v60  ;;  %v301_v0 = vpop.xlane.xlu1 %300  ;;  %v450_v21 = vmul.f32 2.0, %v447_v14  ;;  %v56_v34 = vpop.f32.mrf.mxu0  ;;  %vm113_vm11 = vcmp.eq.s32.totalorder %v1019_v3, 1 }
  0x83   :  { %v304_v1 = vmul.f32 2.0, %v301_v0  ;;  %v247_v7 = vadd.f32 0.5, %v235_v2  ;;  %v61_v36 = vmul.f32 2.0, %v56_v34 }
  0x84   :  { %177 = vperm.xlu2 %780, %v174_v61   ;;  %104 = vperm.xlu1 %782, %v101_v63   ;;  %v452_v25 = vsub.f32 %v803_v20, %v450_v21 }
  0x85   :  { %v306_v4 = vsub.f32 %v801_v62, %v304_v1 }
  0x86   :  { %v453_v31 = vadd.f32 %v452_v25, %v962_v29 }
  0x87   :  { %v307_v6 = vadd.f32 %v306_v4, %v962_v29 }
  0x88   :  { %v454_v39 = vmax.f32 %v453_v31, 0.0 }
  0x89   :  { %v308_v13 = vmax.f32 %v307_v6, 0.0  ;;  %v1031_v15 = vpop.permute.xlu2 %330  ;;  %v869_v6 = vmov 0.0  }
  0x8a   :  { %v374_v10 = vpop.xlane.xlu1 %373  ;;  %v466_v44 = vadd.f32 0.5, %v454_v39  ;;  %vm332_vm15 = vcmp.eq.s32.totalorder %v1031_v15, 1 }
  0x8b   :  { %v377_v12 = vmul.f32 2.0, %v374_v10  ;;  %v320_v18 = vadd.f32 0.5, %v308_v13 }
  0x8c   :  { %250 = vperm.xlu2 %780, %v247_v7   ;;  %184 = vperm.xlu1 %782, %v182_v8  }
  0x8d   :  { %v379_v16 = vsub.f32 %v802_v9, %v377_v12 }
  0x8f   :  { %v380_v17 = vadd.f32 %v379_v16, %v962_v29 }
  0x91   :  { %v381_v26 = vmax.f32 %v380_v17, 0.0  ;;  %v391_v27 = vpop.permute.xlu2 %390 }
  0x92   :  { %vm392_vm0 = vcmp.ne.s32.totalorder %v1041_v23, %v391_v27  ;;  %v1063_v47 = vpop.xlane.xlu1 %519 }
  0x93   :  { %v406_v30 = vsel %vm392_vm0, 1, %v868_v11  ;;  %v393_v32 = vadd.f32 0.5, %v381_v26  ;;  %v523_v34 = vmul.f32 2.0, %v1063_v47 }
  0x94   :  { %323 = vperm.xlu2 %780, %v320_v18   ;;  %257 = vperm.xlu1 %782, %v255_v22   ;;  %v407_v33 = vperm.slane %v406_v30, 0  ;;  %v65_v38 = vpop.permute.xlu0 %64 }
  0x95   :  { %v67_v40 = vsub.f32 %v65_v38, %v61_v36 }
  0x96   :  { %vm408_vm3 = vcmp.eq.s32.totalorder %v407_v33, 1  ;;  %v805_v33 = vld [vmem:[%s1151_s3 + $0x6] ss:$0 sm:$0xff] }
  0x97   :  { %v71_v42 = vadd.f32 %v807_v37, %v67_v40  ;;  %v525_v36 = vsub.f32 %v805_v33, %v523_v34  ;;  %v806_v37 = vld [vmem:[%s1151_s3 + $0x7] ss:$0 sm:$0xff] }
  0x99   :  { %v404_v41 = vpop.permute.xlu2 %403  ;;  %v72_v45 = vmax.f32 %v71_v42, 0.0  ;;  %v526_v39 = vadd.f32 %v525_v36, %v962_v29  ;;  %v796_v42 = vld [vmem:[%s1149_s1 + $0x7] ss:$0 sm:$0xff] }
  0x9a   :  { %vm405_vm5 = vcmp.eq.s32.totalorder %v404_v41, 1  ;;  %v1067_v50 = vpop.xlane.xlu1 %592 }
  0x9b   :  { %vm1057_vm6 = vmand %vm405_vm5, %vm408_vm3  ;;  %74 = vst.msk [vmem:[#allocation2] sm:$0xff] %vm73_vm7, %v72_v45  ;;  %v596_v38 = vmul.f32 2.0, %v1067_v50  ;;  %v527_v41 = vmax.f32 %v526_v39, 0.0 }
  0x9c   :  { %396 = vperm.xlu2 %780, %v393_v32   ;;  %463 = vperm.xlu1 %782, %v734_v35   ;;  %v172_v49 = vpop.permute.xlu0 %171  ;;  %v797_v35 = vld [vmem:[%s1149_s1 + $0x6] ss:$0 sm:$0xff] }
  0x9d   :  { %vm173_vm10 = vcmp.ne.s32.totalorder %v1041_v23, %v172_v49  ;;  %v598_v40 = vsub.f32 %v806_v37, %v596_v38 }
  0x9e   :  { %v187_v2 = vsel %vm173_vm10, 1, %v868_v11 }
  0x9f   :  { %v188_v5 = vperm.slane %v187_v2, 0 }
  0xa1   :  { %v1065_v48 = vpop.permute.xlu2 %609 }
  0xa2   :  { %v810_v59 = vld [vmem:[#allocation2 + $0x3] ss:$0 sm:$0xff]  ;;  %v812_v60 = vld [vmem:[#allocation2] ss:$0 sm:$0xff]  ;;  %v808_v4 = vld [vmem:[#allocation2 + $0x1] ss:$0 sm:$0xff] }
  0xa3   :  { %v809_v15 = vld [vmem:[#allocation2 + $0x2] ss:$0 sm:$0xff] }
  0xa4   :  { %469 = vperm.xlu2 %780, %v466_v44   ;;  %476 = vperm.xlu1 %782, %v474_v46   ;;  %v245_v52 = vpop.permute.xlu0 %244  ;;  %v599_v44 = vadd.f32 %v598_v40, %v962_v29  ;;  %v539_v46 = vadd.f32 0.5, %v527_v41  ;;  %v811_v29 = vld [vmem:[#allocation2 + $0x4] ss:$0 sm:$0xff] }
  0xa5   :  { %vm246_vm3 = vcmp.ne.s32.totalorder %v1041_v23, %v245_v52 }
  0xa6   :  { %v260_v14 = vsel %vm246_vm3, 1, %v868_v11  ;;  %vm533_vm3 = vcmp.ne.s32.totalorder %v950_v24, 6  ;;  %v600_v47 = vmax.f32 %v599_v44, 0.0 }
  0xa7   :  { %v261_v20 = vperm.slane %v260_v14, 0 }
  0xa8   :  { %v612_v49 = vadd.f32 0.5, %v600_v47 }
  0xac   :  { %v318_v55 = vpop.permute.xlu0 %317 }
  0xad   :  { %vm319_vm9 = vcmp.ne.s32.totalorder %v1041_v23, %v318_v55 }
  0xae   :  { %v333_v58 = vsel %vm319_vm9, 1, %v868_v11 }
  0xaf   :  { %v334_v62 = vperm.slane %v333_v58, 0 }
  0xb1   :  { %vm335_vm0 = vcmp.eq.s32.totalorder %v334_v62, 1 }
  0xb2   :  { %v99_v53 = vpop.permute.xlu1 %98  ;;  %vm336_vm4 = vmand %vm332_vm15, %vm335_vm0 }
  0xb3   :  { %vm100_vm8 = vcmp.ne.s32.totalorder %v1041_v23, %v99_v53 }
  0xb4   :  { %v114_v56 = vsel %vm100_vm8, 1, %v868_v11  ;;  %vm189_vm8 = vcmp.eq.s32.totalorder %v188_v5, 1 }
  0xb5   :  { %v115_v57 = vperm.slane %v114_v56, 0 }
  0xb7   :  { %vm116_vm12 = vcmp.eq.s32.totalorder %v115_v57, 1  ;;  %v813_v57 = vld [vmem:[#allocation2 + $0x5] ss:$0 sm:$0xff] }
  0xb8   :  { %vm117_vm13 = vmand %vm113_vm11, %vm116_vm12 }
  0xde   :  { %v178_v51 = vpop.permute.xlu2 %177 }
  0xdf   :  { %v181_v8 = vsub.f32 %v178_v51, %v808_v4  ;;  %v537_v4 = vpop.permute.xlu0 %536 }
  0xe1   :  { %vm191_vm10 = vcmp.gt.f32.partialorder %v181_v8, 0.0 }
  0xe6   :  { %v251_v54 = vpop.permute.xlu2 %250 }
  0xe7   :  { %v254_v25 = vsub.f32 %v251_v54, %v809_v15 }
  0xe9   :  { %vm264_vm15 = vcmp.gt.f32.partialorder %v254_v25, 0.0 }
  0xee   :  { %v324_v61 = vpop.permute.xlu2 %323 }
  0xef   :  { %v327_v0 = vsub.f32 %v324_v61, %v810_v59 }
  0xf1   :  { %vm337_vm2 = vcmp.gt.f32.partialorder %v327_v0, 0.0 }
  0xf2   :  { %vm1081_vm5 = vmand %vm336_vm4, %vm337_vm2  ;;  %vm531_vm2 = vcmp.eq.s32.totalorder %v941_v19, %v797_v35 }
  0xf3   :  { %v339_v16 = vsel %vm1081_vm5, %v327_v0, 0.0  ;;  %vm534_vm4 = vmand %vm531_vm2, %vm533_vm3  ;;  %v727_v58 = vsel %vm1081_vm5, 1.0, %v869_v6  ;;  %vm611_vm5 = vcmp.ne.s32.totalorder %v1041_v23, %v1065_v48 }
  0xf4   :  { %v340_v26 = vsel %vm73_vm7, %v339_v16, 0.0  ;;  %v547_v45 = vsel %vm534_vm4, 1, %v868_v11  ;;  %v354_v59 = vsel %vm73_vm7, %v727_v58, 0.0 }
  0xf6   :  { %v105_v63 = vpop.permute.xlu1 %104  ;;  %v397_v52 = vpop.permute.xlu2 %396 }
  0xf7   :  { %v108_v1 = vsub.f32 %v105_v63, %v812_v60  ;;  %v400_v54 = vsub.f32 %v397_v52, %v811_v29 }
  0xf9   :  { %vm118_vm14 = vcmp.gt.f32.partialorder %v108_v1, 0.0 }
  0xfa   :  { %vm119_vm1 = vmand %vm117_vm13, %vm118_vm14  ;;  %vm262_vm13 = vcmp.eq.s32.totalorder %v261_v20, 1 }
  0xfb   :  { %v715_v7 = vsel %vm119_vm1, 1.0, %v869_v6  ;;  %v120_v3 = vsel %vm119_vm1, %v108_v1, 0.0 }
  0xfc   :  { %v135_v9 = vsel %vm73_vm7, %v715_v7, 0.0  ;;  %v121_v10 = vsel %vm73_vm7, %v120_v3, 0.0 }
  0xfd   :  { %136 = vadd.xlane.f32.xlu1 %v135_v9  ;;  %122 = vadd.xlane.f32.xlu2 %v121_v10 }
  0xfe   :  { %v185_v12 = vpop.permute.xlu1 %184  ;;  %v470_v56 = vpop.permute.xlu2 %469 }
  0xff   :  { %vm186_vm9 = vcmp.eq.s32.totalorder %v185_v12, 1 }
 0x100   :  { %vm190_vm11 = vmand %vm186_vm9, %vm189_vm8  ;;  %vm604_vm8 = vcmp.eq.s32.totalorder %v941_v19, %v796_v42  ;;  %vm606_vm9 = vcmp.ne.s32.totalorder %v950_v24, 7  ;;  %v473_v24 = vsub.f32 %v470_v56, %v813_v57 }
 0x101   :  { %vm192_vm12 = vmand %vm190_vm11, %vm191_vm10 }
 0x102   :  { %v193_v17 = vsel %vm192_vm12, %v181_v8, 0.0  ;;  %v719_v18 = vsel %vm192_vm12, 1.0, %v869_v6  ;;  %vm607_vm10 = vmand %vm604_vm8, %vm606_vm9 }
 0x103   :  { %v194_v21 = vsel %vm73_vm7, %v193_v17, 0.0  ;;  %v208_v22 = vsel %vm73_vm7, %v719_v18, 0.0  ;;  %v620_v50 = vsel %vm607_vm10, 1, %v868_v11 }
 0x104   :  { %195 = vadd.xlane.f32.xlu0 %v194_v21 }
 0x105   :  { %341 = vadd.xlane.f32.xlu1 %v340_v26  ;;  %209 = vadd.xlane.f32.xlu2 %v208_v22 }
 0x106   :  { %v258_v27 = vpop.permute.xlu1 %257 }
 0x107   :  { %vm259_vm14 = vcmp.eq.s32.totalorder %v258_v27, 1 }
 0x108   :  { %vm263_vm0 = vmand %vm259_vm14, %vm262_vm13  ;;  %vm410_vm13 = vcmp.gt.f32.partialorder %v400_v54, 0.0 }
 0x109   :  { %vm265_vm1 = vmand %vm263_vm0, %vm264_vm15 }
 0x10a   :  { %v266_v28 = vsel %vm265_vm1, %v254_v25, 0.0  ;;  %v723_v30 = vsel %vm265_vm1, 1.0, %v869_v6  ;;  %vm411_vm0 = vmand %vm1057_vm6, %vm410_vm13  ;;  %vm483_vm1 = vcmp.gt.f32.partialorder %v473_v24, 0.0  ;;  %vm538_vm6 = vcmp.ne.s32.totalorder %v1041_v23, %v537_v4 }
 0x10b   :  { %v267_v31 = vsel %vm73_vm7, %v266_v28, 0.0  ;;  %v281_v32 = vsel %vm73_vm7, %v723_v30, 0.0  ;;  %v412_v60 = vsel %vm411_vm0, %v400_v54, 0.0  ;;  %v731_v63 = vsel %vm411_vm0, 1.0, %v869_v6 }
 0x10c   :  { %268 = vadd.xlane.f32.xlu0 %v267_v31  ;;  %v413_v62 = vsel %vm73_vm7, %v412_v60, 0.0  ;;  %v427_v1 = vsel %vm73_vm7, %v731_v63, 0.0  ;;  %v552_v58 = vsel %vm538_vm6, 1, %v868_v11 }
 0x10d   :  { %282 = vadd.xlane.f32.xlu2 %v281_v32 }
 0x10e   :  { %v464_v51 = vpop.permute.xlu1 %463 }
 0x10f   :  { %vm465_vm11 = vcmp.ne.s32.totalorder %v1041_v23, %v464_v51 }
 0x110   :  { %v479_v53 = vsel %vm465_vm11, 1, %v868_v11 }
 0x111   :  { %v480_v19 = vperm.slane %v479_v53, 0 }
 0x113   :  { %vm481_vm14 = vcmp.eq.s32.totalorder %v480_v19, 1 }
 0x116   :  { %v477_v55 = vpop.permute.xlu1 %476 }
 0x117   :  { %vm478_vm12 = vcmp.eq.s32.totalorder %v477_v55, 1 }
 0x118   :  { %vm482_vm15 = vmand %vm478_vm12, %vm481_vm14 }
 0x119   :  { %vm484_vm2 = vmand %vm482_vm15, %vm483_vm1 }
 0x11a   :  { %v485_v61 = vsel %vm484_vm2, %v473_v24, 0.0  ;;  %v735_v2 = vsel %vm484_vm2, 1.0, %v869_v6 }
 0x11b   :  { %v486_v0 = vsel %vm73_vm7, %v485_v61, 0.0  ;;  %v500_v43 = vsel %vm73_vm7, %v735_v2, 0.0  ;;  %v815_v61 = vld [vmem:[#allocation2 + $0x6] ss:$0 sm:$0xff]  ;;  %v814_v2 = vld [vmem:[#allocation2 + $0x7] ss:$0 sm:$0xff] }
 0x11e   :  { %549 = vperm.xlu1 %782, %v547_v45  }
 0x120   :  { %542 = vperm.xlu0 %781, %v539_v46  }
 0x125   :  { %615 = vperm.xlu2 %780, %v612_v49  }
 0x128   :  { %622 = vperm.xlu0 %781, %v620_v50  }
 0x148   :  { %355 = vadd.xlane.f32.xlu1 %v354_v59  ;;  %v553_v59 = vperm.slane %v552_v58, 0 }
 0x14a   :  { %vm554_vm4 = vcmp.eq.s32.totalorder %v553_v59, 1 }
 0x14e   :  { %414 = vadd.xlane.f32.xlu2 %v413_v62 }
 0x150   :  { %487 = vadd.xlane.f32.xlu1 %v486_v0  ;;  %v625_v0 = vsel %vm611_vm5, 1, %v868_v11 }
 0x152   :  { %428 = vadd.xlane.f32.xlu0 %v427_v1 }
 0x156   :  { %501 = vadd.xlane.f32.xlu2 %v500_v43  ;;  %v626_v43 = vperm.slane %v625_v0, 0 }
 0x158   :  { %vm627_vm11 = vcmp.eq.s32.totalorder %v626_v43, 1 }
 0x170   :  { %v137_v5 = vpop.xlane.xlu1 %136  ;;  %v123_v7 = vpop.xlane.xlu2 %122 }
 0x171   :  { %v138_v3 = vrot.slane %v137_v5, 4  ;;  %v124_v8 = vrot.slane %v123_v7, 4 }
 0x173   :  { %v139_v9 = vadd.f32 %v138_v3, %v137_v5  ;;  %v125_v10 = vadd.f32 %v124_v8, %v123_v7 }
 0x175   :  { %v140_v12 = vrot.slane %v139_v9, 2  ;;  %v126_v13 = vrot.slane %v125_v10, 2 }
 0x177   :  { %v196_v14 = vpop.xlane.xlu0 %195  ;;  %v127_v15 = vadd.f32 %v126_v13, %v125_v10  ;;  %v141_v16 = vadd.f32 %v140_v12, %v139_v9 }
 0x178   :  { %v197_v17 = vrot.slane %v196_v14, 4  ;;  %v342_v18 = vpop.xlane.xlu1 %341  ;;  %v210_v20 = vpop.xlane.xlu2 %209 }
 0x179   :  { %v343_v21 = vrot.slane %v342_v18, 4  ;;  %v211_v22 = vrot.slane %v210_v20, 4  ;;  %v128_v25 = vrot.slane %v127_v15, 1  ;;  %v142_v26 = vrot.slane %v141_v16, 1 }
 0x17a   :  { %v198_v27 = vadd.f32 %v197_v17, %v196_v14 }
 0x17b   :  { %v212_v28 = vadd.f32 %v211_v22, %v210_v20  ;;  %v129_v30 = vadd.f32 %v128_v25, %v127_v15  ;;  %v143_v31 = vadd.f32 %v142_v26, %v141_v16  ;;  %v344_v33 = vadd.f32 %v343_v21, %v342_v18 }
 0x17c   :  { %v199_v32 = vrot.slane %v198_v27, 2 }
 0x17d   :  { %v213_v34 = vrot.slane %v212_v28, 2  ;;  %744 = vpush %v129_v30  ;;  %v345_v38 = vrot.slane %v344_v33, 2 }
 0x17e   :  { %746 = vpush %v143_v31  ;;  %v200_v35 = vadd.f32 %v199_v32, %v198_v27 }
 0x17f   :  { %v269_v36 = vpop.xlane.xlu0 %268  ;;  %v214_v37 = vadd.f32 %v213_v34, %v212_v28  ;;  %v346_v51 = vadd.f32 %v345_v38, %v344_v33 }
 0x180   :  { %v270_v39 = vrot.slane %v269_v36, 4  ;;  %v283_v40 = vpop.xlane.xlu2 %282  ;;  %v201_v41 = vrot.slane %v200_v35, 1 }
 0x181   :  { %v284_v42 = vrot.slane %v283_v40, 4  ;;  %v215_v44 = vrot.slane %v214_v37, 1  ;;  %v347_v55 = vrot.slane %v346_v51, 1 }
 0x182   :  { %v271_v45 = vadd.f32 %v270_v39, %v269_v36  ;;  %v202_v46 = vadd.f32 %v201_v41, %v200_v35 }
 0x183   :  { %v285_v47 = vadd.f32 %v284_v42, %v283_v40  ;;  %v216_v49 = vadd.f32 %v215_v44, %v214_v37  ;;  %v348_v24 = vadd.f32 %v347_v55, %v346_v51 }
 0x184   :  { %v272_v50 = vrot.slane %v271_v45, 2  ;;  %748 = vpush %v202_v46 }
 0x185   :  { %v286_v52 = vrot.slane %v285_v47, 2  ;;  %750 = vpush %v216_v49 }
 0x186   :  { %v273_v29 = vadd.f32 %v272_v50, %v271_v45 }
 0x187   :  { %v287_v53 = vadd.f32 %v286_v52, %v285_v47 }
 0x188   :  { %v274_v54 = vrot.slane %v273_v29, 1  ;;  %v616_v1 = vpop.permute.xlu2 %615 }
 0x189   :  { %v288_v56 = vrot.slane %v287_v53, 1  ;;  %v619_v7 = vsub.f32 %v616_v1, %v814_v2 }
 0x18a   :  { %v275_v19 = vadd.f32 %v274_v54, %v273_v29 }
 0x18b   :  { %v289_v57 = vadd.f32 %v288_v56, %v287_v53  ;;  %vm629_vm13 = vcmp.gt.f32.partialorder %v619_v7, 0.0 }
 0x18c   :  { %752 = vpush %v275_v19 }
 0x18d   :  { %754 = vpush %v289_v57 }
 0x18e   :  { %756 = vpush %v348_v24 }
 0x190   :  { %v550_v60 = vpop.permute.xlu1 %549 }
 0x191   :  { %vm551_vm3 = vcmp.eq.s32.totalorder %v550_v60, 1 }
 0x192   :  { %v543_v62 = vpop.permute.xlu0 %542  ;;  %vm555_vm8 = vmand %vm551_vm3, %vm554_vm4 }
 0x193   :  { %v546_v63 = vsub.f32 %v543_v62, %v815_v61 }
 0x195   :  { %vm556_vm9 = vcmp.gt.f32.partialorder %v546_v63, 0.0 }
 0x196   :  { %vm557_vm10 = vmand %vm555_vm8, %vm556_vm9 }
 0x197   :  { %v739_v4 = vsel %vm557_vm10, 1.0, %v869_v6  ;;  %v558_v5 = vsel %vm557_vm10, %v546_v63, 0.0 }
 0x198   :  { %v573_v3 = vsel %vm73_vm7, %v739_v4, 0.0  ;;  %v559_v23 = vsel %vm73_vm7, %v558_v5, 0.0 }
 0x199   :  { %574 = vadd.xlane.f32.xlu1 %v573_v3  ;;  %560 = vadd.xlane.f32.xlu0 %v559_v23 }
 0x19a   :  { %v623_v48 = vpop.permute.xlu0 %622 }
 0x19b   :  { %vm624_vm12 = vcmp.eq.s32.totalorder %v623_v48, 1 }
 0x19c   :  { %vm628_vm14 = vmand %vm624_vm12, %vm627_vm11 }
 0x19d   :  { %vm630_vm15 = vmand %vm628_vm14, %vm629_vm13 }
 0x19e   :  { %v631_v11 = vsel %vm630_vm15, %v619_v7, 0.0  ;;  %v743_v8 = vsel %vm630_vm15, 1.0, %v869_v6 }
 0x19f   :  { %v632_v9 = vsel %vm73_vm7, %v631_v11, 0.0  ;;  %v646_v10 = vsel %vm73_vm7, %v743_v8, 0.0 }
 0x1a0   :  { %633 = vadd.xlane.f32.xlu2 %v632_v9 }
 0x1a1   :  { %647 = vadd.xlane.f32.xlu0 %v646_v10 }
 0x1ae   :  { %s745_s1 = spop %744 }
 0x1af   :  { %s747_s3 = spop %746 }
 0x1b5   :  { %s749_s19 = spop %748 }
 0x1b6   :  { %s751_s20 = spop %750  ;;  %v204_v10 = vstv %s749_s19 }
 0x1bb   :  { %v356_v12 = vpop.xlane.xlu1 %355 }
 0x1bc   :  { %v357_v13 = vrot.slane %v356_v12, 4 }
 0x1bd   :  { %s753_s21 = spop %752 }
 0x1be   :  { %v358_v14 = vadd.f32 %v357_v13, %v356_v12  ;;  %s755_s22 = spop %754  ;;  %v131_v12 = vstv %s745_s1  ;;  %v277_v13 = vstv %s753_s21 }
 0x1bf   :  { %s757_s4 = spop %756 }
 0x1c0   :  { %v359_v15 = vrot.slane %v358_v14, 2 }
 0x1c1   :  { %v415_v16 = vpop.xlane.xlu2 %414 }
 0x1c2   :  { %v416_v17 = vrot.slane %v415_v16, 4  ;;  %v360_v18 = vadd.f32 %v359_v15, %v358_v14  ;;  %v205_v14 = vadd.f32 %v204_v10, %v131_v12  ;;  %v218_v15 = vstv %s751_s20 }
 0x1c3   :  { %v488_v20 = vpop.xlane.xlu1 %487 }
 0x1c4   :  { %v417_v21 = vadd.f32 %v416_v17, %v415_v16  ;;  %v489_v22 = vrot.slane %v488_v20, 4  ;;  %v361_v25 = vrot.slane %v360_v18, 1  ;;  %v145_v16 = vstv %s747_s3 }
 0x1c5   :  { %v429_v26 = vpop.xlane.xlu0 %428  ;;  %v278_v17 = vadd.f32 %v277_v13, %v205_v14 }
 0x1c6   :  { %v418_v27 = vrot.slane %v417_v21, 2  ;;  %v490_v6 = vadd.f32 %v489_v22, %v488_v20  ;;  %v430_v28 = vrot.slane %v429_v26, 4  ;;  %v362_v30 = vadd.f32 %v361_v25, %v360_v18 }
 0x1c7   :  { %v291_v18 = vstv %s755_s22  ;;  %v219_v20 = vadd.f32 %v218_v15, %v145_v16 }
 0x1c8   :  { %v491_v31 = vrot.slane %v490_v6, 2  ;;  %v431_v32 = vadd.f32 %v430_v28, %v429_v26  ;;  %758 = vpush %v362_v30  ;;  %v419_v33 = vadd.f32 %v418_v27, %v417_v21  ;;  %v350_v21 = vstv %s757_s4 }
 0x1c9   :  { %v502_v34 = vpop.xlane.xlu2 %501  ;;  %v292_v25 = vadd.f32 %v291_v18, %v219_v20  ;;  %v351_v27 = vadd.f32 %v350_v21, %v278_v17 }
 0x1ca   :  { %v432_v35 = vrot.slane %v431_v32, 2  ;;  %v503_v36 = vrot.slane %v502_v34, 4  ;;  %v420_v37 = vrot.slane %v419_v33, 1  ;;  %v492_v38 = vadd.f32 %v491_v31, %v490_v6 }
 0x1cc   :  { %v504_v39 = vadd.f32 %v503_v36, %v502_v34  ;;  %v421_v40 = vadd.f32 %v420_v37, %v419_v33  ;;  %v433_v41 = vadd.f32 %v432_v35, %v431_v32  ;;  %v493_v42 = vrot.slane %v492_v38, 1 }
 0x1ce   :  { %v505_v44 = vrot.slane %v504_v39, 2  ;;  %760 = vpush %v421_v40  ;;  %v434_v45 = vrot.slane %v433_v41, 1  ;;  %v494_v49 = vadd.f32 %v493_v42, %v492_v38 }
 0x1d0   :  { %v435_v46 = vadd.f32 %v434_v45, %v433_v41  ;;  %v506_v47 = vadd.f32 %v505_v44, %v504_v39 }
 0x1d2   :  { %762 = vpush %v435_v46  ;;  %v507_v50 = vrot.slane %v506_v47, 1 }
 0x1d3   :  { %764 = vpush %v494_v49 }
 0x1d4   :  { %v508_v51 = vadd.f32 %v507_v50, %v506_v47 }
 0x1d6   :  { %766 = vpush %v508_v51 }
 0x1f9   :  { %s759_s23 = spop %758 }
 0x1fa   :  { %v364_v22 = vstv %s759_s23 }
 0x1fb   :  { %v365_v28 = vadd.f32 %v364_v22, %v292_v25 }
 0x1ff   :  { %s761_s24 = spop %760 }
 0x200   :  { %v423_v26 = vstv %s761_s24 }
 0x201   :  { %v424_v31 = vadd.f32 %v423_v26, %v351_v27 }
 0x203   :  { %s763_s25 = spop %762 }
 0x204   :  { %s765_s26 = spop %764  ;;  %v437_v6 = vstv %s763_s25 }
 0x205   :  { %v496_v30 = vstv %s765_s26  ;;  %v438_v33 = vadd.f32 %v437_v6, %v365_v28 }
 0x206   :  { %v497_v35 = vadd.f32 %v496_v30, %v424_v31 }
 0x207   :  { %s767_s27 = spop %766 }
 0x208   :  { %v510_v32 = vstv %s767_s27 }
 0x209   :  { %v511_v37 = vadd.f32 %v510_v32, %v438_v33 }
 0x20c   :  { %v561_v52 = vpop.xlane.xlu0 %560  ;;  %v575_v29 = vpop.xlane.xlu1 %574 }
 0x20d   :  { %v562_v53 = vrot.slane %v561_v52, 4  ;;  %v576_v54 = vrot.slane %v575_v29, 4 }
 0x20f   :  { %v563_v55 = vadd.f32 %v562_v53, %v561_v52  ;;  %v577_v56 = vadd.f32 %v576_v54, %v575_v29 }
 0x211   :  { %v564_v19 = vrot.slane %v563_v55, 2  ;;  %v578_v57 = vrot.slane %v577_v56, 2 }
 0x213   :  { %v579_v24 = vadd.f32 %v578_v57, %v577_v56  ;;  %v634_v58 = vpop.xlane.xlu2 %633  ;;  %v565_v59 = vadd.f32 %v564_v19, %v563_v55 }
 0x214   :  { %v635_v60 = vrot.slane %v634_v58, 4  ;;  %v648_v61 = vpop.xlane.xlu0 %647 }
 0x215   :  { %v649_v62 = vrot.slane %v648_v61, 4  ;;  %v566_v63 = vrot.slane %v565_v59, 1  ;;  %v580_v0 = vrot.slane %v579_v24, 1 }
 0x216   :  { %v636_v1 = vadd.f32 %v635_v60, %v634_v58 }
 0x217   :  { %v650_v2 = vadd.f32 %v649_v62, %v648_v61  ;;  %v567_v43 = vadd.f32 %v566_v63, %v565_v59  ;;  %v581_v4 = vadd.f32 %v580_v0, %v579_v24 }
 0x218   :  { %v637_v5 = vrot.slane %v636_v1, 2 }
 0x219   :  { %v651_v7 = vrot.slane %v650_v2, 2  ;;  %768 = vpush %v567_v43 }
 0x21a   :  { %v638_v3 = vadd.f32 %v637_v5, %v636_v1  ;;  %770 = vpush %v581_v4 }
 0x21b   :  { %v652_v23 = vadd.f32 %v651_v7, %v650_v2 }
 0x21c   :  { %v639_v48 = vrot.slane %v638_v3, 1 }
 0x21d   :  { %v653_v11 = vrot.slane %v652_v23, 1 }
 0x21e   :  { %v640_v8 = vadd.f32 %v639_v48, %v638_v3 }
 0x21f   :  { %v654_v9 = vadd.f32 %v653_v11, %v652_v23 }
 0x220   :  { %772 = vpush %v640_v8 }
 0x221   :  { %774 = vpush %v654_v9 }
 0x24a   :  { %s769_s28 = spop %768 }
 0x24b   :  { %s771_s29 = spop %770  ;;  %v569_v34 = vstv %s769_s28 }
 0x24c   :  { %v583_v36 = vstv %s771_s29  ;;  %v570_v38 = vadd.f32 %v569_v34, %v497_v35 }
 0x24d   :  { %v584_v39 = vadd.f32 %v583_v36, %v511_v37 }
 0x251   :  { %s773_s2 = spop %772 }
 0x252   :  { %v642_v40 = vstv %s773_s2  ;;  %s775_s15 = spop %774 }
 0x253   :  { %v643_v41 = vadd.f32 %v642_v40, %v570_v38  ;;  %v656_v42 = vstv %s775_s15 }
 0x254   :  { %v657_v44 = vadd.f32 %v656_v42, %v584_v39 }
 0x255   :  { %658 = vst [vmem:[#allocation3] sm:$0xff] %v643_v41 }
 0x256   :  { %659 = vst [vmem:[#allocation5] sm:$0xff] %v657_v44  ;;  %670 = dma.vmem_to_hbm [thread:$0]  %s666_s7, 128, %s668_s9, [#allocation4]  }
 0x257   :  { %681 = dma.vmem_to_hbm [thread:$0]  %s677_s11, 128, %s679_s14, [#allocation6]  }
 0x258   :  { %864 = dma.done.wait [#allocation4], 128  }
 0x259   :  { %865 = vsyncadd [#allocation4], 4294967168 }
 0x25a   :  { %866 = dma.done.wait [#allocation6], 128  }
 0x25b   :  { %867 = vsyncadd [#allocation6], 4294967168 }
 0x25c   :  { %690 = vsyncpa [#allocation4], 1 }
 0x25d   :  { %691 = vsyncpa [#allocation6], 1 }

</bundles_post_ra>
